<compile_context>
chip_gen: v7x
topology: tpu7x:2x2x1
jax: 0.10.0
libtpu: 0.0.40
codegen_flags: <defaults>
</compile_context>

<pallas_src>
import functools

import jax
import jax.numpy as jnp
from jax.experimental import pallas as pl
from jax.experimental.pallas import tpu as pltpu


def _vmem_limit_bytes():
    """~85% of physical VMEM (review: leave headroom on v7x, use >64MiB on v6e)."""
    try:
        cap = getattr(pltpu.get_tpu_info(), "vmem_capacity_bytes", None)
    except Exception:
        cap = None
    if not cap:
        return 56 * 1024 * 1024        # safe on every generation
    return int(cap * 0.85)


# ----------------------------------------------------------------------------
# In-kernel helpers
# ----------------------------------------------------------------------------
def _ln(z, g, b, eps=1e-5):
    """LayerNorm with fused single-pass statistics (E[x], E[x^2])."""
    mu = jnp.mean(z, axis=-1, keepdims=True)
    ms = jnp.mean(z * z, axis=-1, keepdims=True)
    var = ms - mu * mu
    return (z - mu) * jax.lax.rsqrt(var + eps) * g + b


# ----------------------------------------------------------------------------
# Fused transformer kernel: grid = (batch, depth)
# ----------------------------------------------------------------------------
def _transformer_kernel(
        x_ref,                                                   # (1, N, Cin)
        pjw_ref, pjb_ref, eg_ref, eb_ref, pos_ref,               # embed
        n1g_ref, n1b_ref, qkvw_ref, qkvb_ref, pw_ref, pb_ref,    # block (d)
        n2g_ref, n2b_ref, f1w_ref, f1b_ref, f2w_ref, f2b_ref,    # block (d)
        fg_ref, fb_ref,                                          # final LN
        o_ref,                                                   # (1, N, C)
        xs_ref,                                                  # VMEM (N, C) f32
        *, num_heads, head_chunk):
    d = pl.program_id(1)

    # ---- patch embed: 1x1 conv (= per-position GEMM), LN, +pos (d == 0) ----
    @pl.when(d == 0)
    def _():
        xin = x_ref[0].astype(jnp.bfloat16)                      # (N, Cin)
        y = jnp.dot(xin, pjw_ref[...],
                    preferred_element_type=jnp.float32) + pjb_ref[...]
        y = _ln(y, eg_ref[...], eb_ref[...])
        xs_ref[...] = y + pos_ref[...]        # dropout = identity (inference)

    x = xs_ref[...]                                              # (N, C) fp32
    N, C = x.shape
    hd = C // num_heads

    # ---- sub-block 1: x = x + Attention(LN1(x)) ----
    h = _ln(x, n1g_ref[0], n1b_ref[0]).astype(jnp.bfloat16)
    # NOTE: 1/sqrt(hd) is already folded into the Q columns of qkv_w / qkv_b.
    qkv = jnp.dot(h, qkvw_ref[0],
                  preferred_element_type=jnp.float32) + qkvb_ref[0]   # (N, 3C)

    acc = jnp.zeros((N, C), jnp.float32)
    for c in range(num_heads // head_chunk):
        lo, hi = c * head_chunk * hd, (c + 1) * head_chunk * hd

        def to_heads(t):     # (N, Hc*hd) -> (Hc, N, hd), bf16 BEFORE transpose
            return jnp.transpose(
                t.astype(jnp.bfloat16).reshape(N, head_chunk, hd), (1, 0, 2))

        q = to_heads(qkv[:, lo:hi])
        k = to_heads(qkv[:, C + lo:C + hi])
        v = to_heads(qkv[:, 2 * C + lo:2 * C + hi])

        s = jnp.einsum('hnd,hmd->hnm', q, k,
                       preferred_element_type=jnp.float32)       # (Hc, N, N)
        s = s - jnp.max(s, axis=-1, keepdims=True)
        p = jnp.exp(s)
        row_sum = jnp.sum(p, axis=-1, keepdims=True)             # (Hc, N, 1)
        # Deferred softmax normalisation: PV on un-normalised bf16 probs,
        # scale the much smaller (Hc, N, hd) result afterwards (EUP recip).
        pv = jnp.einsum('hnm,hmd->hnd', p.astype(jnp.bfloat16), v,
                        preferred_element_type=jnp.float32)      # (Hc, N, hd)
        pv = pv * pl.reciprocal(row_sum, approx=True)
        pv2 = jnp.transpose(pv.astype(jnp.bfloat16),
                            (1, 0, 2)).reshape(N, head_chunk * hd)
        # Project this chunk of heads against the matching rows of proj W.
        acc = acc + jnp.dot(pv2, pw_ref[0, lo:hi, :],
                            preferred_element_type=jnp.float32)

    x1 = x + acc + pb_ref[0]                  # dropout = identity (inference)

    # ---- sub-block 2: x = x + MLP(LN2(x)) ----
    h2 = _ln(x1, n2g_ref[0], n2b_ref[0]).astype(jnp.bfloat16)
    m = jnp.dot(h2, f1w_ref[0],
                preferred_element_type=jnp.float32) + f1b_ref[0]      # (N, Hid)
    # tanh-approx GELU runs on the EUP; ~1e-3 deviation vs torch's exact erf.
    m = jax.nn.gelu(m, approximate=True)
    m = jnp.dot(m.astype(jnp.bfloat16), f2w_ref[0],
                preferred_element_type=jnp.float32) + f2b_ref[0]      # (N, C)
    x2 = x1 + m                               # dropout = identity (inference)
    xs_ref[...] = x2

    # ---- final LayerNorm + output store, only on the last block ----
    @pl.when(d == pl.num_programs(1) - 1)
    def _():
        o_ref[0] = _ln(x2, fg_ref[...], fb_ref[...]).astype(o_ref.dtype)


# ----------------------------------------------------------------------------
# pallas_call wrapper
# ----------------------------------------------------------------------------
def transformer_forward(x_img, kparams, *, num_heads, head_chunk=None):
    """x_img: (B, Cin, H, W) -> (B, embed_dim, H, W)."""
    embed_w, block_w, final_w = kparams
    B, Cin, Himg, Wimg = x_img.shape
    N = Himg * Wimg
    E = embed_w[0].shape[1]
    depth = block_w[0].shape[0]
    assert E % num_heads == 0
    if head_chunk is None:
        head_chunk = 2 if num_heads % 2 == 0 else 1
    head_chunk = min(head_chunk, num_heads)
    assert num_heads % head_chunk == 0

    # (B, Cin, H, W) -> (B, N, Cin): layout plumbing done in the wrapper.
    x_seq = jnp.transpose(x_img.reshape(B, Cin, N), (0, 2, 1))

    def const_spec(arr):
        """Grid-invariant weight: full array, single-buffered."""
        zeros = (0,) * arr.ndim
        return pl.BlockSpec(arr.shape, lambda b, d, z=zeros: z,
                            pipeline_mode=pl.Buffered(1))

    def depth_spec(arr):
        """Depth-stacked block weight: stream block d's slice each step."""
        blk = (1,) + arr.shape[1:]
        zeros = (0,) * (arr.ndim - 1)
        return pl.BlockSpec(blk, lambda b, d, z=zeros: (d,) + z)

    weights = (*embed_w, *block_w, *final_w)
    in_specs = ([pl.BlockSpec((1, N, Cin), lambda b, d: (b, 0, 0))]
                + [const_spec(w) for w in embed_w]
                + [depth_spec(w) for w in block_w]
                + [const_spec(w) for w in final_w])

    kernel = functools.partial(_transformer_kernel,
                               num_heads=num_heads, head_chunk=head_chunk)

    out = pl.pallas_call(
        kernel,
        out_shape=jax.ShapeDtypeStruct((B, N, E), jnp.float32),
        grid_spec=pltpu.PrefetchScalarGridSpec(
            num_scalar_prefetch=0,
            grid=(B, depth),
            in_specs=in_specs,
            out_specs=pl.BlockSpec((1, N, E), lambda b, d: (b, 0, 0)),
            scratch_shapes=[pltpu.VMEM((N, E), jnp.float32)],
        ),
        compiler_params=pltpu.CompilerParams(
            dimension_semantics=("parallel", "arbitrary"),
            vmem_limit_bytes=_vmem_limit_bytes()),
    )(x_seq, *weights)

    # (B, N, E) -> (B, E, H, W)
    return jnp.transpose(out, (0, 2, 1)).reshape(B, E, Himg, Wimg)


# ----------------------------------------------------------------------------
# Parameters
# ----------------------------------------------------------------------------
def sinusoid_pos_table(num_patch, embed_dim):
    # Same formula as PositionalEncoding.get_position_table, sized to the
    # configured (num_patch, embed_dim) (the original hard-codes 690 x 512).
    pos = jnp.arange(num_patch, dtype=jnp.float32)[:, None]
    i = jnp.arange(embed_dim, dtype=jnp.float32)[None, :]
    angle = pos / jnp.power(10000.0, 2.0 * jnp.floor(i / 2.0) / embed_dim)
    even = (jnp.arange(embed_dim) % 2) == 0
    return jnp.where(even, jnp.sin(angle), jnp.cos(angle)).astype(jnp.float32)


def init_raw_params(key, *, in_c, embed_dim, num_heads, depth, mlp_ratio,
                    num_patches):
    hidden = int(embed_dim * mlp_ratio)
    s = 0.02
    keys = iter(jax.random.split(key, 4 + 12 * depth + 2))
    nrm = lambda shape: s * jax.random.normal(next(keys), shape, jnp.float32)
    gamma = lambda: 1.0 + nrm((1, embed_dim))
    beta = lambda: nrm((1, embed_dim))

    proj_w = nrm((in_c, embed_dim))          # Conv2d 1x1 weight, (in, out)
    proj_b = nrm((1, embed_dim))
    eg, eb = gamma(), beta()
    pos = sinusoid_pos_table(num_patches, embed_dim)

    blocks = []
    for _ in range(depth):
        n1g, n1b = gamma(), beta()
        qkv_w = nrm((embed_dim, 3 * embed_dim))
        qkv_b = nrm((1, 3 * embed_dim))
        pw = nrm((embed_dim, embed_dim))
        pb = nrm((1, embed_dim))
        n2g, n2b = gamma(), beta()
        f1w = nrm((embed_dim, hidden))
        f1b = nrm((1, hidden))
        f2w = nrm((hidden, embed_dim))
        f2b = nrm((1, embed_dim))
        blocks.append((n1g, n1b, qkv_w, qkv_b, pw, pb,
                       n2g, n2b, f1w, f1b, f2w, f2b))
    fg, fb = gamma(), beta()
    return (proj_w, proj_b, eg, eb, pos, tuple(blocks), fg, fb)


def prepare_params(raw, num_heads):
    """Kernel-ready params: depth-stacked bf16 GEMM weights, scale folded into Q."""
    proj_w, proj_b, eg, eb, pos, blocks, fg, fb = raw
    C = proj_w.shape[1]
    hd = C // num_heads
    scale = hd ** -0.5

    embed_w = (proj_w.astype(jnp.bfloat16), proj_b, eg, eb, pos)

    def stack(idx):
        return jnp.stack([blk[idx] for blk in blocks])

    n1g, n1b = stack(0), stack(1)
    qkv_w, qkv_b = stack(2), stack(3)
    qkv_w = qkv_w.at[:, :, :C].multiply(scale)   # fold 1/sqrt(hd) into Q
    qkv_b = qkv_b.at[:, :, :C].multiply(scale)
    pw, pb = stack(4), stack(5)
    n2g, n2b = stack(6), stack(7)
    f1w, f1b = stack(8), stack(9)
    f2w, f2b = stack(10), stack(11)

    block_w = (n1g, n1b,
               qkv_w.astype(jnp.bfloat16), qkv_b,
               pw.astype(jnp.bfloat16), pb,
               n2g, n2b,
               f1w.astype(jnp.bfloat16), f1b,
               f2w.astype(jnp.bfloat16), f2b)
    return (embed_w, block_w, (fg, fb))


# ----------------------------------------------------------------------------
# Pure-JAX reference (fp32, mirrors the PyTorch module, dropout = identity)
# ----------------------------------------------------------------------------
def transformer_reference(x_img, raw, num_heads):
    proj_w, proj_b, eg, eb, pos, blocks, fg, fb = raw
    B, Cin, H, W = x_img.shape
    N = H * W
    C = proj_w.shape[1]
    hd = C // num_heads

    def ln(z, g, b):
        mu = jnp.mean(z, -1, keepdims=True)
        var = jnp.mean((z - mu) ** 2, -1, keepdims=True)
        return (z - mu) / jnp.sqrt(var + 1e-5) * g + b

    x = jnp.transpose(x_img.reshape(B, Cin, N), (0, 2, 1))
    x = x @ proj_w + proj_b
    x = ln(x, eg, eb)
    x = x + pos

    for (n1g, n1b, qkv_w, qkv_b, pw, pb, n2g, n2b,
         f1w, f1b, f2w, f2b) in blocks:
        h = ln(x, n1g, n1b)
        qkv = h @ qkv_w + qkv_b
        qkv = qkv.reshape(B, N, 3, num_heads, hd).transpose(2, 0, 3, 1, 4)
        q, k, v = qkv[0], qkv[1], qkv[2]
        att = (q @ jnp.swapaxes(k, -2, -1)) * (hd ** -0.5)
        att = jax.nn.softmax(att, axis=-1)
        y = (att @ v).transpose(0, 2, 1, 3).reshape(B, N, C)
        x = x + (y @ pw + pb)
        h2 = ln(x, n2g, n2b)
        m = jax.nn.gelu(h2 @ f1w + f1b, approximate=False) @ f2w + f2b
        x = x + m

    x = ln(x, fg, fb)
    return jnp.transpose(x, (0, 2, 1)).reshape(B, C, H, W)


# ----------------------------------------------------------------------------
# Self-test
# ----------------------------------------------------------------------------
if __name__ == "__main__":
    # Small shapes consistent with the module: (B, in_c, H, W) image input.
    B, in_c = 2, 16
    H, W = 2, 4                  # N = 8 patches
    embed_dim, num_heads = 32, 4
    depth, mlp_ratio = 2, 4

    key = jax.random.PRNGKey(0)
    kx, kp = jax.random.split(key)
    x = jax.random.normal(kx, (B, in_c, H, W), jnp.float32)

    raw = init_raw_params(kp, in_c=in_c, embed_dim=embed_dim,
                          num_heads=num_heads, depth=depth,
                          mlp_ratio=mlp_ratio, num_patches=H * W)
    kparams = prepare_params(raw, num_heads)

    out = transformer_forward(x, kparams, num_heads=num_heads)
    out = jax.block_until_ready(out)

    ref = transformer_reference(x, raw, num_heads)
    assert out.shape == (B, embed_dim, H, W)
    # bf16 GEMM operands (fp32 accumulation) + tanh GELU + approx reciprocal
    # vs fp32 exact reference -> loosened tolerance.
    max_err = float(jnp.max(jnp.abs(out - ref)))
    assert jnp.allclose(out, ref, atol=5e-2, rtol=5e-2), \
        f"mismatch vs reference (max abs err {max_err})"

    print("KERNEL_OK")
</pallas_src>

<mosaic_0001>
module attributes {stable_mosaic.version = 11 : i64} {
  func.func @_transformer_kernel(%arg0: i32, %arg1: i32, %arg2: memref<1x8x16xf32, #tpu.memory_space<vmem>>, %arg3: memref<16x32xbf16, #tpu.memory_space<vmem>>, %arg4: memref<1x32xf32, #tpu.memory_space<vmem>>, %arg5: memref<1x32xf32, #tpu.memory_space<vmem>>, %arg6: memref<1x32xf32, #tpu.memory_space<vmem>>, %arg7: memref<8x32xf32, #tpu.memory_space<vmem>>, %arg8: memref<1x1x32xf32, #tpu.memory_space<vmem>>, %arg9: memref<1x1x32xf32, #tpu.memory_space<vmem>>, %arg10: memref<1x32x96xbf16, #tpu.memory_space<vmem>>, %arg11: memref<1x1x96xf32, #tpu.memory_space<vmem>>, %arg12: memref<1x32x32xbf16, #tpu.memory_space<vmem>>, %arg13: memref<1x1x32xf32, #tpu.memory_space<vmem>>, %arg14: memref<1x1x32xf32, #tpu.memory_space<vmem>>, %arg15: memref<1x1x32xf32, #tpu.memory_space<vmem>>, %arg16: memref<1x32x128xbf16, #tpu.memory_space<vmem>>, %arg17: memref<1x1x128xf32, #tpu.memory_space<vmem>>, %arg18: memref<1x128x32xbf16, #tpu.memory_space<vmem>>, %arg19: memref<1x1x32xf32, #tpu.memory_space<vmem>>, %arg20: memref<1x32xf32, #tpu.memory_space<vmem>>, %arg21: memref<1x32xf32, #tpu.memory_space<vmem>>, %arg22: memref<1x8x32xf32, #tpu.memory_space<vmem>>, %arg23: memref<8x32xf32, #tpu.memory_space<vmem>>) attributes {dimension_semantics = [#tpu.dimension_semantics<parallel>, #tpu.dimension_semantics<arbitrary>], iteration_bounds = array<i64: 2, 2>, scalar_prefetch = 0 : i64, scratch_operands = 1 : i64, tpu.core_type = #tpu.core_type<tc>, window_params = [{transform_indices = @transform_0, window_bounds = array<i64: 1, 8, 16>}, {pipeline_mode = #tpu.pipeline_mode<synchronous>, transform_indices = @transform_1, window_bounds = array<i64: 16, 32>}, {pipeline_mode = #tpu.pipeline_mode<synchronous>, transform_indices = @transform_2, window_bounds = array<i64: 1, 32>}, {pipeline_mode = #tpu.pipeline_mode<synchronous>, transform_indices = @transform_3, window_bounds = array<i64: 1, 32>}, {pipeline_mode = #tpu.pipeline_mode<synchronous>, transform_indices = @transform_4, window_bounds = array<i64: 1, 32>}, {pipeline_mode = #tpu.pipeline_mode<synchronous>, transform_indices = @transform_5, window_bounds = array<i64: 8, 32>}, {transform_indices = @transform_6, window_bounds = array<i64: 1, 1, 32>}, {transform_indices = @transform_7, window_bounds = array<i64: 1, 1, 32>}, {transform_indices = @transform_8, window_bounds = array<i64: 1, 32, 96>}, {transform_indices = @transform_9, window_bounds = array<i64: 1, 1, 96>}, {transform_indices = @transform_10, window_bounds = array<i64: 1, 32, 32>}, {transform_indices = @transform_11, window_bounds = array<i64: 1, 1, 32>}, {transform_indices = @transform_12, window_bounds = array<i64: 1, 1, 32>}, {transform_indices = @transform_13, window_bounds = array<i64: 1, 1, 32>}, {transform_indices = @transform_14, window_bounds = array<i64: 1, 32, 128>}, {transform_indices = @transform_15, window_bounds = array<i64: 1, 1, 128>}, {transform_indices = @transform_16, window_bounds = array<i64: 1, 128, 32>}, {transform_indices = @transform_17, window_bounds = array<i64: 1, 1, 32>}, {pipeline_mode = #tpu.pipeline_mode<synchronous>, transform_indices = @transform_18, window_bounds = array<i64: 1, 32>}, {pipeline_mode = #tpu.pipeline_mode<synchronous>, transform_indices = @transform_19, window_bounds = array<i64: 1, 32>}, {transform_indices = @transform_20, window_bounds = array<i64: 1, 8, 32>}]} {
    %c0_i32 = arith.constant 0 : i32
    %0 = arith.cmpi eq, %arg1, %c0_i32 : i32
    %1 = arith.extui %0 : i1 to i32
    %c0_i32_0 = arith.constant 0 : i32
    %2 = arith.cmpi ne, %1, %c0_i32_0 : i32
    scf.if %2 {
      %c0_70 = arith.constant 0 : index
      %c0_71 = arith.constant 0 : index
      %c0_72 = arith.constant 0 : index
      %168 = vector.load %arg2[%c0_70, %c0_71, %c0_72] : memref<1x8x16xf32, #tpu.memory_space<vmem>>, vector<1x8x16xf32>
      %169 = vector.shape_cast %168 : vector<1x8x16xf32> to vector<8x16xf32>
      %170 = arith.truncf %169 : vector<8x16xf32> to vector<8x16xbf16>
      %c0_73 = arith.constant 0 : index
      %c0_74 = arith.constant 0 : index
      %171 = vector.load %arg3[%c0_73, %c0_74] : memref<16x32xbf16, #tpu.memory_space<vmem>>, vector<16x32xbf16>
      %cst_75 = arith.constant dense<0.000000e+00> : vector<8x32xf32>
      %172 = tpu.matmul %170, %171, %cst_75 {dimension_numbers = #tpu.dot_dimension_numbers<[1], [0], [0], [1], [0, 0, 1, 1], [], []>} : vector<8x16xbf16>, vector<16x32xbf16>, vector<8x32xf32> -> vector<8x32xf32>
      %c0_76 = arith.constant 0 : index
      %c0_77 = arith.constant 0 : index
      %173 = vector.load %arg4[%c0_76, %c0_77] : memref<1x32xf32, #tpu.memory_space<vmem>>, vector<1x32xf32>
      %174 = vector.broadcast %173 : vector<1x32xf32> to vector<8x32xf32>
      %175 = arith.addf %172, %174 : vector<8x32xf32>
      %c0_78 = arith.constant 0 : index
      %c0_79 = arith.constant 0 : index
      %176 = vector.load %arg5[%c0_78, %c0_79] : memref<1x32xf32, #tpu.memory_space<vmem>>, vector<1x32xf32>
      %c0_80 = arith.constant 0 : index
      %c0_81 = arith.constant 0 : index
      %177 = vector.load %arg6[%c0_80, %c0_81] : memref<1x32xf32, #tpu.memory_space<vmem>>, vector<1x32xf32>
      %cst_82 = arith.constant dense<0.000000e+00> : vector<8xf32>
      %178 = vector.multi_reduction <add>, %175, %cst_82 [1] : vector<8x32xf32> to vector<8xf32>
      %179 = vector.shape_cast %178 : vector<8xf32> to vector<8x1xf32>
      %cst_83 = arith.constant 3.200000e+01 : f32
      %180 = vector.broadcast %cst_83 : f32 to vector<8x1xf32>
      %181 = arith.divf %179, %180 : vector<8x1xf32>
      %182 = arith.mulf %175, %175 : vector<8x32xf32>
      %cst_84 = arith.constant dense<0.000000e+00> : vector<8xf32>
      %183 = vector.multi_reduction <add>, %182, %cst_84 [1] : vector<8x32xf32> to vector<8xf32>
      %184 = vector.shape_cast %183 : vector<8xf32> to vector<8x1xf32>
      %cst_85 = arith.constant 3.200000e+01 : f32
      %185 = vector.broadcast %cst_85 : f32 to vector<8x1xf32>
      %186 = arith.divf %184, %185 : vector<8x1xf32>
      %187 = arith.mulf %181, %181 : vector<8x1xf32>
      %188 = arith.subf %186, %187 : vector<8x1xf32>
      %189 = vector.broadcast %181 : vector<8x1xf32> to vector<8x32xf32>
      %190 = arith.subf %175, %189 : vector<8x32xf32>
      %cst_86 = arith.constant 9.99999974E-6 : f32
      %191 = vector.broadcast %cst_86 : f32 to vector<8x1xf32>
      %192 = arith.addf %188, %191 : vector<8x1xf32>
      %193 = math.rsqrt %192 : vector<8x1xf32>
      %194 = vector.broadcast %193 : vector<8x1xf32> to vector<8x32xf32>
      %195 = arith.mulf %190, %194 : vector<8x32xf32>
      %196 = vector.broadcast %176 : vector<1x32xf32> to vector<8x32xf32>
      %197 = arith.mulf %195, %196 : vector<8x32xf32>
      %198 = vector.broadcast %177 : vector<1x32xf32> to vector<8x32xf32>
      %199 = arith.addf %197, %198 : vector<8x32xf32>
      %c0_87 = arith.constant 0 : index
      %c0_88 = arith.constant 0 : index
      %200 = vector.load %arg7[%c0_87, %c0_88] : memref<8x32xf32, #tpu.memory_space<vmem>>, vector<8x32xf32>
      %201 = arith.addf %199, %200 : vector<8x32xf32>
      %c0_89 = arith.constant 0 : index
      %c0_90 = arith.constant 0 : index
      %202 = vector.load %arg23[%c0_89, %c0_90] : memref<8x32xf32, #tpu.memory_space<vmem>>, vector<8x32xf32>
      tpu.vector_store %arg23[%c0_89, %c0_90], %201 {strides = array<i32>} : memref<8x32xf32, #tpu.memory_space<vmem>>, vector<8x32xf32>,
    } else {
    }
    %c0 = arith.constant 0 : index
    %c0_1 = arith.constant 0 : index
    %3 = vector.load %arg23[%c0, %c0_1] : memref<8x32xf32, #tpu.memory_space<vmem>>, vector<8x32xf32>
    %c0_2 = arith.constant 0 : index
    %c0_3 = arith.constant 0 : index
    %c0_4 = arith.constant 0 : index
    %4 = vector.load %arg8[%c0_2, %c0_3, %c0_4] : memref<1x1x32xf32, #tpu.memory_space<vmem>>, vector<1x1x32xf32>
    %5 = vector.shape_cast %4 : vector<1x1x32xf32> to vector<1x32xf32>
    %c0_5 = arith.constant 0 : index
    %c0_6 = arith.constant 0 : index
    %c0_7 = arith.constant 0 : index
    %6 = vector.load %arg9[%c0_5, %c0_6, %c0_7] : memref<1x1x32xf32, #tpu.memory_space<vmem>>, vector<1x1x32xf32>
    %7 = vector.shape_cast %6 : vector<1x1x32xf32> to vector<1x32xf32>
    %cst = arith.constant dense<0.000000e+00> : vector<8xf32>
    %8 = vector.multi_reduction <add>, %3, %cst [1] : vector<8x32xf32> to vector<8xf32>
    %9 = vector.shape_cast %8 : vector<8xf32> to vector<8x1xf32>
    %cst_8 = arith.constant 3.200000e+01 : f32
    %10 = vector.broadcast %cst_8 : f32 to vector<8x1xf32>
    %11 = arith.divf %9, %10 : vector<8x1xf32>
    %12 = arith.mulf %3, %3 : vector<8x32xf32>
    %cst_9 = arith.constant dense<0.000000e+00> : vector<8xf32>
    %13 = vector.multi_reduction <add>, %12, %cst_9 [1] : vector<8x32xf32> to vector<8xf32>
    %14 = vector.shape_cast %13 : vector<8xf32> to vector<8x1xf32>
    %cst_10 = arith.constant 3.200000e+01 : f32
    %15 = vector.broadcast %cst_10 : f32 to vector<8x1xf32>
    %16 = arith.divf %14, %15 : vector<8x1xf32>
    %17 = arith.mulf %11, %11 : vector<8x1xf32>
    %18 = arith.subf %16, %17 : vector<8x1xf32>
    %19 = vector.broadcast %11 : vector<8x1xf32> to vector<8x32xf32>
    %20 = arith.subf %3, %19 : vector<8x32xf32>
    %cst_11 = arith.constant 9.99999974E-6 : f32
    %21 = vector.broadcast %cst_11 : f32 to vector<8x1xf32>
    %22 = arith.addf %18, %21 : vector<8x1xf32>
    %23 = math.rsqrt %22 : vector<8x1xf32>
    %24 = vector.broadcast %23 : vector<8x1xf32> to vector<8x32xf32>
    %25 = arith.mulf %20, %24 : vector<8x32xf32>
    %26 = vector.broadcast %5 : vector<1x32xf32> to vector<8x32xf32>
    %27 = arith.mulf %25, %26 : vector<8x32xf32>
    %28 = vector.broadcast %7 : vector<1x32xf32> to vector<8x32xf32>
    %29 = arith.addf %27, %28 : vector<8x32xf32>
    %30 = arith.truncf %29 : vector<8x32xf32> to vector<8x32xbf16>
    %c0_12 = arith.constant 0 : index
    %c0_13 = arith.constant 0 : index
    %c0_14 = arith.constant 0 : index
    %31 = vector.load %arg10[%c0_12, %c0_13, %c0_14] : memref<1x32x96xbf16, #tpu.memory_space<vmem>>, vector<1x32x96xbf16>
    %32 = vector.shape_cast %31 : vector<1x32x96xbf16> to vector<32x96xbf16>
    %cst_15 = arith.constant dense<0.000000e+00> : vector<8x96xf32>
    %33 = tpu.matmul %30, %32, %cst_15 {dimension_numbers = #tpu.dot_dimension_numbers<[1], [0], [0], [1], [0, 0, 1, 1], [], []>} : vector<8x32xbf16>, vector<32x96xbf16>, vector<8x96xf32> -> vector<8x96xf32>
    %c0_16 = arith.constant 0 : index
    %c0_17 = arith.constant 0 : index
    %c0_18 = arith.constant 0 : index
    %34 = vector.load %arg11[%c0_16, %c0_17, %c0_18] : memref<1x1x96xf32, #tpu.memory_space<vmem>>, vector<1x1x96xf32>
    %35 = vector.shape_cast %34 : vector<1x1x96xf32> to vector<1x96xf32>
    %36 = vector.broadcast %35 : vector<1x96xf32> to vector<8x96xf32>
    %37 = arith.addf %33, %36 : vector<8x96xf32>
    %cst_19 = arith.constant 0.000000e+00 : f32
    %38 = vector.broadcast %cst_19 : f32 to vector<8x32xf32>
    %39 = vector.extract_strided_slice %37 {offsets = [0, 0], sizes = [8, 16], strides = [1, 1]} : vector<8x96xf32> to vector<8x16xf32>
    %40 = arith.truncf %39 : vector<8x16xf32> to vector<8x16xbf16>
    %41 = vector.shape_cast %40 : vector<8x16xbf16> to vector<8x2x8xbf16>
    %42 = tpu.transpose %41, [1, 0, 2] : vector<8x2x8xbf16> -> vector<2x8x8xbf16>
    %43 = vector.extract_strided_slice %37 {offsets = [0, 32], sizes = [8, 16], strides = [1, 1]} : vector<8x96xf32> to vector<8x16xf32>
    %44 = arith.truncf %43 : vector<8x16xf32> to vector<8x16xbf16>
    %45 = vector.shape_cast %44 : vector<8x16xbf16> to vector<8x2x8xbf16>
    %46 = tpu.transpose %45, [1, 0, 2] : vector<8x2x8xbf16> -> vector<2x8x8xbf16>
    %47 = vector.extract_strided_slice %37 {offsets = [0, 64], sizes = [8, 16], strides = [1, 1]} : vector<8x96xf32> to vector<8x16xf32>
    %48 = arith.truncf %47 : vector<8x16xf32> to vector<8x16xbf16>
    %49 = vector.shape_cast %48 : vector<8x16xbf16> to vector<8x2x8xbf16>
    %50 = tpu.transpose %49, [1, 0, 2] : vector<8x2x8xbf16> -> vector<2x8x8xbf16>
    "tpu.trace_start"() <{level = 10 : i32, message = "hnd,hmd->hnm"}> : () -> ()
    %cst_20 = arith.constant dense<0.000000e+00> : vector<2x8x8xf32>
    %51 = tpu.matmul %42, %46, %cst_20 {dimension_numbers = #tpu.dot_dimension_numbers<[2], [2], [1], [1], [0, 0, 0, 1, 1, 1], [0], [0]>} : vector<2x8x8xbf16>, vector<2x8x8xbf16>, vector<2x8x8xf32> -> vector<2x8x8xf32>
    "tpu.trace_stop"() : () -> ()
    %cst_21 = arith.constant dense<0xFF800000> : vector<2x8xf32>
    %52 = vector.multi_reduction <maximumf>, %51, %cst_21 [2] : vector<2x8x8xf32> to vector<2x8xf32>
    %53 = vector.shape_cast %52 : vector<2x8xf32> to vector<2x8x1xf32>
    %54 = vector.broadcast %53 : vector<2x8x1xf32> to vector<2x8x8xf32>
    %55 = arith.subf %51, %54 : vector<2x8x8xf32>
    %56 = math.exp %55 : vector<2x8x8xf32>
    %cst_22 = arith.constant dense<0.000000e+00> : vector<2x8xf32>
    %57 = vector.multi_reduction <add>, %56, %cst_22 [2] : vector<2x8x8xf32> to vector<2x8xf32>
    %58 = vector.shape_cast %57 : vector<2x8xf32> to vector<2x8x1xf32>
    %59 = arith.truncf %56 : vector<2x8x8xf32> to vector<2x8x8xbf16>
    "tpu.trace_start"() <{level = 10 : i32, message = "hnm,hmd->hnd"}> : () -> ()
    %cst_23 = arith.constant dense<0.000000e+00> : vector<2x8x8xf32>
    %60 = tpu.matmul %59, %50, %cst_23 {dimension_numbers = #tpu.dot_dimension_numbers<[2], [1], [1], [2], [0, 0, 0, 1, 1, 2], [0], [0]>} : vector<2x8x8xbf16>, vector<2x8x8xbf16>, vector<2x8x8xf32> -> vector<2x8x8xf32>
    "tpu.trace_stop"() : () -> ()
    %61 = tpu.reciprocal %58 {approx = true} : vector<2x8x1xf32> -> vector<2x8x1xf32>
    %62 = vector.broadcast %61 : vector<2x8x1xf32> to vector<2x8x8xf32>
    %63 = arith.mulf %60, %62 : vector<2x8x8xf32>
    %64 = arith.truncf %63 : vector<2x8x8xf32> to vector<2x8x8xbf16>
    %65 = tpu.transpose %64, [1, 0, 2] : vector<2x8x8xbf16> -> vector<8x2x8xbf16>
    %66 = vector.shape_cast %65 : vector<8x2x8xbf16> to vector<8x16xbf16>
    %c0_24 = arith.constant 0 : index
    %c0_25 = arith.constant 0 : index
    %c0_26 = arith.constant 0 : index
    %67 = vector.load %arg12[%c0_24, %c0_25, %c0_26] : memref<1x32x32xbf16, #tpu.memory_space<vmem>>, vector<1x16x32xbf16>
    %68 = vector.shape_cast %67 : vector<1x16x32xbf16> to vector<16x32xbf16>
    %cst_27 = arith.constant dense<0.000000e+00> : vector<8x32xf32>
    %69 = tpu.matmul %66, %68, %cst_27 {dimension_numbers = #tpu.dot_dimension_numbers<[1], [0], [0], [1], [0, 0, 1, 1], [], []>} : vector<8x16xbf16>, vector<16x32xbf16>, vector<8x32xf32> -> vector<8x32xf32>
    %70 = arith.addf %38, %69 : vector<8x32xf32>
    %71 = vector.extract_strided_slice %37 {offsets = [0, 16], sizes = [8, 16], strides = [1, 1]} : vector<8x96xf32> to vector<8x16xf32>
    %72 = arith.truncf %71 : vector<8x16xf32> to vector<8x16xbf16>
    %73 = vector.shape_cast %72 : vector<8x16xbf16> to vector<8x2x8xbf16>
    %74 = tpu.transpose %73, [1, 0, 2] : vector<8x2x8xbf16> -> vector<2x8x8xbf16>
    %75 = vector.extract_strided_slice %37 {offsets = [0, 48], sizes = [8, 16], strides = [1, 1]} : vector<8x96xf32> to vector<8x16xf32>
    %76 = arith.truncf %75 : vector<8x16xf32> to vector<8x16xbf16>
    %77 = vector.shape_cast %76 : vector<8x16xbf16> to vector<8x2x8xbf16>
    %78 = tpu.transpose %77, [1, 0, 2] : vector<8x2x8xbf16> -> vector<2x8x8xbf16>
    %79 = vector.extract_strided_slice %37 {offsets = [0, 80], sizes = [8, 16], strides = [1, 1]} : vector<8x96xf32> to vector<8x16xf32>
    %80 = arith.truncf %79 : vector<8x16xf32> to vector<8x16xbf16>
    %81 = vector.shape_cast %80 : vector<8x16xbf16> to vector<8x2x8xbf16>
    %82 = tpu.transpose %81, [1, 0, 2] : vector<8x2x8xbf16> -> vector<2x8x8xbf16>
    "tpu.trace_start"() <{level = 10 : i32, message = "hnd,hmd->hnm"}> : () -> ()
    %cst_28 = arith.constant dense<0.000000e+00> : vector<2x8x8xf32>
    %83 = tpu.matmul %74, %78, %cst_28 {dimension_numbers = #tpu.dot_dimension_numbers<[2], [2], [1], [1], [0, 0, 0, 1, 1, 1], [0], [0]>} : vector<2x8x8xbf16>, vector<2x8x8xbf16>, vector<2x8x8xf32> -> vector<2x8x8xf32>
    "tpu.trace_stop"() : () -> ()
    %cst_29 = arith.constant dense<0xFF800000> : vector<2x8xf32>
    %84 = vector.multi_reduction <maximumf>, %83, %cst_29 [2] : vector<2x8x8xf32> to vector<2x8xf32>
    %85 = vector.shape_cast %84 : vector<2x8xf32> to vector<2x8x1xf32>
    %86 = vector.broadcast %85 : vector<2x8x1xf32> to vector<2x8x8xf32>
    %87 = arith.subf %83, %86 : vector<2x8x8xf32>
    %88 = math.exp %87 : vector<2x8x8xf32>
    %cst_30 = arith.constant dense<0.000000e+00> : vector<2x8xf32>
    %89 = vector.multi_reduction <add>, %88, %cst_30 [2] : vector<2x8x8xf32> to vector<2x8xf32>
    %90 = vector.shape_cast %89 : vector<2x8xf32> to vector<2x8x1xf32>
    %91 = arith.truncf %88 : vector<2x8x8xf32> to vector<2x8x8xbf16>
    "tpu.trace_start"() <{level = 10 : i32, message = "hnm,hmd->hnd"}> : () -> ()
    %cst_31 = arith.constant dense<0.000000e+00> : vector<2x8x8xf32>
    %92 = tpu.matmul %91, %82, %cst_31 {dimension_numbers = #tpu.dot_dimension_numbers<[2], [1], [1], [2], [0, 0, 0, 1, 1, 2], [0], [0]>} : vector<2x8x8xbf16>, vector<2x8x8xbf16>, vector<2x8x8xf32> -> vector<2x8x8xf32>
    "tpu.trace_stop"() : () -> ()
    %93 = tpu.reciprocal %90 {approx = true} : vector<2x8x1xf32> -> vector<2x8x1xf32>
    %94 = vector.broadcast %93 : vector<2x8x1xf32> to vector<2x8x8xf32>
    %95 = arith.mulf %92, %94 : vector<2x8x8xf32>
    %96 = arith.truncf %95 : vector<2x8x8xf32> to vector<2x8x8xbf16>
    %97 = tpu.transpose %96, [1, 0, 2] : vector<2x8x8xbf16> -> vector<8x2x8xbf16>
    %98 = vector.shape_cast %97 : vector<8x2x8xbf16> to vector<8x16xbf16>
    %c0_32 = arith.constant 0 : index
    %c16 = arith.constant 16 : index
    %c0_33 = arith.constant 0 : index
    %99 = vector.load %arg12[%c0_32, %c16, %c0_33] : memref<1x32x32xbf16, #tpu.memory_space<vmem>>, vector<1x16x32xbf16>
    %100 = vector.shape_cast %99 : vector<1x16x32xbf16> to vector<16x32xbf16>
    %cst_34 = arith.constant dense<0.000000e+00> : vector<8x32xf32>
    %101 = tpu.matmul %98, %100, %cst_34 {dimension_numbers = #tpu.dot_dimension_numbers<[1], [0], [0], [1], [0, 0, 1, 1], [], []>} : vector<8x16xbf16>, vector<16x32xbf16>, vector<8x32xf32> -> vector<8x32xf32>
    %102 = arith.addf %70, %101 : vector<8x32xf32>
    %103 = arith.addf %3, %102 : vector<8x32xf32>
    %c0_35 = arith.constant 0 : index
    %c0_36 = arith.constant 0 : index
    %c0_37 = arith.constant 0 : index
    %104 = vector.load %arg13[%c0_35, %c0_36, %c0_37] : memref<1x1x32xf32, #tpu.memory_space<vmem>>, vector<1x1x32xf32>
    %105 = vector.shape_cast %104 : vector<1x1x32xf32> to vector<1x32xf32>
    %106 = vector.broadcast %105 : vector<1x32xf32> to vector<8x32xf32>
    %107 = arith.addf %103, %106 : vector<8x32xf32>
    %c0_38 = arith.constant 0 : index
    %c0_39 = arith.constant 0 : index
    %c0_40 = arith.constant 0 : index
    %108 = vector.load %arg14[%c0_38, %c0_39, %c0_40] : memref<1x1x32xf32, #tpu.memory_space<vmem>>, vector<1x1x32xf32>
    %109 = vector.shape_cast %108 : vector<1x1x32xf32> to vector<1x32xf32>
    %c0_41 = arith.constant 0 : index
    %c0_42 = arith.constant 0 : index
    %c0_43 = arith.constant 0 : index
    %110 = vector.load %arg15[%c0_41, %c0_42, %c0_43] : memref<1x1x32xf32, #tpu.memory_space<vmem>>, vector<1x1x32xf32>
    %111 = vector.shape_cast %110 : vector<1x1x32xf32> to vector<1x32xf32>
    %cst_44 = arith.constant dense<0.000000e+00> : vector<8xf32>
    %112 = vector.multi_reduction <add>, %107, %cst_44 [1] : vector<8x32xf32> to vector<8xf32>
    %113 = vector.shape_cast %112 : vector<8xf32> to vector<8x1xf32>
    %cst_45 = arith.constant 3.200000e+01 : f32
    %114 = vector.broadcast %cst_45 : f32 to vector<8x1xf32>
    %115 = arith.divf %113, %114 : vector<8x1xf32>
    %116 = arith.mulf %107, %107 : vector<8x32xf32>
    %cst_46 = arith.constant dense<0.000000e+00> : vector<8xf32>
    %117 = vector.multi_reduction <add>, %116, %cst_46 [1] : vector<8x32xf32> to vector<8xf32>
    %118 = vector.shape_cast %117 : vector<8xf32> to vector<8x1xf32>
    %cst_47 = arith.constant 3.200000e+01 : f32
    %119 = vector.broadcast %cst_47 : f32 to vector<8x1xf32>
    %120 = arith.divf %118, %119 : vector<8x1xf32>
    %121 = arith.mulf %115, %115 : vector<8x1xf32>
    %122 = arith.subf %120, %121 : vector<8x1xf32>
    %123 = vector.broadcast %115 : vector<8x1xf32> to vector<8x32xf32>
    %124 = arith.subf %107, %123 : vector<8x32xf32>
    %cst_48 = arith.constant 9.99999974E-6 : f32
    %125 = vector.broadcast %cst_48 : f32 to vector<8x1xf32>
    %126 = arith.addf %122, %125 : vector<8x1xf32>
    %127 = math.rsqrt %126 : vector<8x1xf32>
    %128 = vector.broadcast %127 : vector<8x1xf32> to vector<8x32xf32>
    %129 = arith.mulf %124, %128 : vector<8x32xf32>
    %130 = vector.broadcast %109 : vector<1x32xf32> to vector<8x32xf32>
    %131 = arith.mulf %129, %130 : vector<8x32xf32>
    %132 = vector.broadcast %111 : vector<1x32xf32> to vector<8x32xf32>
    %133 = arith.addf %131, %132 : vector<8x32xf32>
    %134 = arith.truncf %133 : vector<8x32xf32> to vector<8x32xbf16>
    %c0_49 = arith.constant 0 : index
    %c0_50 = arith.constant 0 : index
    %c0_51 = arith.constant 0 : index
    %135 = vector.load %arg16[%c0_49, %c0_50, %c0_51] : memref<1x32x128xbf16, #tpu.memory_space<vmem>>, vector<1x32x128xbf16>
    %136 = vector.shape_cast %135 : vector<1x32x128xbf16> to vector<32x128xbf16>
    %cst_52 = arith.constant dense<0.000000e+00> : vector<8x128xf32>
    %137 = tpu.matmul %134, %136, %cst_52 {dimension_numbers = #tpu.dot_dimension_numbers<[1], [0], [0], [1], [0, 0, 1, 1], [], []>} : vector<8x32xbf16>, vector<32x128xbf16>, vector<8x128xf32> -> vector<8x128xf32>
    %c0_53 = arith.constant 0 : index
    %c0_54 = arith.constant 0 : index
    %c0_55 = arith.constant 0 : index
    %138 = vector.load %arg17[%c0_53, %c0_54, %c0_55] : memref<1x1x128xf32, #tpu.memory_space<vmem>>, vector<1x1x128xf32>
    %139 = vector.shape_cast %138 : vector<1x1x128xf32> to vector<1x128xf32>
    %140 = vector.broadcast %139 : vector<1x128xf32> to vector<8x128xf32>
    %141 = arith.addf %137, %140 : vector<8x128xf32>
    %142 = arith.mulf %141, %141 : vector<8x128xf32>
    %143 = arith.mulf %141, %142 : vector<8x128xf32>
    %cst_56 = arith.constant 4.471500e-02 : f32
    %144 = vector.broadcast %cst_56 : f32 to vector<8x128xf32>
    %145 = arith.mulf %144, %143 : vector<8x128xf32>
    %146 = arith.addf %141, %145 : vector<8x128xf32>
    %cst_57 = arith.constant 0.797884583 : f32
    %147 = vector.broadcast %cst_57 : f32 to vector<8x128xf32>
    %148 = arith.mulf %147, %146 : vector<8x128xf32>
    %149 = math.tanh %148 : vector<8x128xf32>
    %cst_58 = arith.constant 1.000000e+00 : f32
    %150 = vector.broadcast %cst_58 : f32 to vector<8x128xf32>
    %151 = arith.addf %150, %149 : vector<8x128xf32>
    %cst_59 = arith.constant 5.000000e-01 : f32
    %152 = vector.broadcast %cst_59 : f32 to vector<8x128xf32>
    %153 = arith.mulf %152, %151 : vector<8x128xf32>
    %154 = arith.mulf %141, %153 : vector<8x128xf32>
    %155 = arith.truncf %154 : vector<8x128xf32> to vector<8x128xbf16>
    %c0_60 = arith.constant 0 : index
    %c0_61 = arith.constant 0 : index
    %c0_62 = arith.constant 0 : index
    %156 = vector.load %arg18[%c0_60, %c0_61, %c0_62] : memref<1x128x32xbf16, #tpu.memory_space<vmem>>, vector<1x128x32xbf16>
    %157 = vector.shape_cast %156 : vector<1x128x32xbf16> to vector<128x32xbf16>
    %cst_63 = arith.constant dense<0.000000e+00> : vector<8x32xf32>
    %158 = tpu.matmul %155, %157, %cst_63 {dimension_numbers = #tpu.dot_dimension_numbers<[1], [0], [0], [1], [0, 0, 1, 1], [], []>} : vector<8x128xbf16>, vector<128x32xbf16>, vector<8x32xf32> -> vector<8x32xf32>
    %c0_64 = arith.constant 0 : index
    %c0_65 = arith.constant 0 : index
    %c0_66 = arith.constant 0 : index
    %159 = vector.load %arg19[%c0_64, %c0_65, %c0_66] : memref<1x1x32xf32, #tpu.memory_space<vmem>>, vector<1x1x32xf32>
    %160 = vector.shape_cast %159 : vector<1x1x32xf32> to vector<1x32xf32>
    %161 = vector.broadcast %160 : vector<1x32xf32> to vector<8x32xf32>
    %162 = arith.addf %158, %161 : vector<8x32xf32>
    %163 = arith.addf %107, %162 : vector<8x32xf32>
    %c0_67 = arith.constant 0 : index
    %c0_68 = arith.constant 0 : index
    %164 = vector.load %arg23[%c0_67, %c0_68] : memref<8x32xf32, #tpu.memory_space<vmem>>, vector<8x32xf32>
    tpu.vector_store %arg23[%c0_67, %c0_68], %163 {strides = array<i32>} : memref<8x32xf32, #tpu.memory_space<vmem>>, vector<8x32xf32>,
    %c1_i32 = arith.constant 1 : i32
    %165 = arith.cmpi eq, %arg1, %c1_i32 : i32
    %166 = arith.extui %165 : i1 to i32
    %c0_i32_69 = arith.constant 0 : i32
    %167 = arith.cmpi ne, %166, %c0_i32_69 : i32
    scf.if %167 {
      %c0_70 = arith.constant 0 : index
      %c0_71 = arith.constant 0 : index
      %168 = vector.load %arg20[%c0_70, %c0_71] : memref<1x32xf32, #tpu.memory_space<vmem>>, vector<1x32xf32>
      %c0_72 = arith.constant 0 : index
      %c0_73 = arith.constant 0 : index
      %169 = vector.load %arg21[%c0_72, %c0_73] : memref<1x32xf32, #tpu.memory_space<vmem>>, vector<1x32xf32>
      %cst_74 = arith.constant dense<0.000000e+00> : vector<8xf32>
      %170 = vector.multi_reduction <add>, %163, %cst_74 [1] : vector<8x32xf32> to vector<8xf32>
      %171 = vector.shape_cast %170 : vector<8xf32> to vector<8x1xf32>
      %cst_75 = arith.constant 3.200000e+01 : f32
      %172 = vector.broadcast %cst_75 : f32 to vector<8x1xf32>
      %173 = arith.divf %171, %172 : vector<8x1xf32>
      %174 = arith.mulf %163, %163 : vector<8x32xf32>
      %cst_76 = arith.constant dense<0.000000e+00> : vector<8xf32>
      %175 = vector.multi_reduction <add>, %174, %cst_76 [1] : vector<8x32xf32> to vector<8xf32>
      %176 = vector.shape_cast %175 : vector<8xf32> to vector<8x1xf32>
      %cst_77 = arith.constant 3.200000e+01 : f32
      %177 = vector.broadcast %cst_77 : f32 to vector<8x1xf32>
      %178 = arith.divf %176, %177 : vector<8x1xf32>
      %179 = arith.mulf %173, %173 : vector<8x1xf32>
      %180 = arith.subf %178, %179 : vector<8x1xf32>
      %181 = vector.broadcast %173 : vector<8x1xf32> to vector<8x32xf32>
      %182 = arith.subf %163, %181 : vector<8x32xf32>
      %cst_78 = arith.constant 9.99999974E-6 : f32
      %183 = vector.broadcast %cst_78 : f32 to vector<8x1xf32>
      %184 = arith.addf %180, %183 : vector<8x1xf32>
      %185 = math.rsqrt %184 : vector<8x1xf32>
      %186 = vector.broadcast %185 : vector<8x1xf32> to vector<8x32xf32>
      %187 = arith.mulf %182, %186 : vector<8x32xf32>
      %188 = vector.broadcast %168 : vector<1x32xf32> to vector<8x32xf32>
      %189 = arith.mulf %187, %188 : vector<8x32xf32>
      %190 = vector.broadcast %169 : vector<1x32xf32> to vector<8x32xf32>
      %191 = arith.addf %189, %190 : vector<8x32xf32>
      %c0_79 = arith.constant 0 : index
      %c0_80 = arith.constant 0 : index
      %c0_81 = arith.constant 0 : index
      %192 = vector.load %arg22[%c0_79, %c0_80, %c0_81] : memref<1x8x32xf32, #tpu.memory_space<vmem>>, vector<1x8x32xf32>
      %193 = vector.shape_cast %192 : vector<1x8x32xf32> to vector<8x32xf32>
      %194 = vector.shape_cast %191 : vector<8x32xf32> to vector<1x8x32xf32>
      tpu.vector_store %arg22[%c0_79, %c0_80, %c0_81], %194 {strides = array<i32>} : memref<1x8x32xf32, #tpu.memory_space<vmem>>, vector<1x8x32xf32>,
    } else {
    }
    return
  }
  func.func @transform_0(%arg0: i32, %arg1: i32) -> (i32, i32, i32) {
    %c0_i32 = arith.constant 0 : i32
    %c0_i32_0 = arith.constant 0 : i32
    %c0_i32_1 = arith.constant 0 : i32
    return %arg0, %c0_i32, %c0_i32_0 : i32, i32, i32
  }
  func.func @transform_1(%arg0: i32, %arg1: i32) -> (i32, i32) {
    %c0_i32 = arith.constant 0 : i32
    %c0_i32_0 = arith.constant 0 : i32
    %c0_i32_1 = arith.constant 0 : i32
    return %c0_i32, %c0_i32_0 : i32, i32
  }
  func.func @transform_2(%arg0: i32, %arg1: i32) -> (i32, i32) {
    %c0_i32 = arith.constant 0 : i32
    %c0_i32_0 = arith.constant 0 : i32
    %c0_i32_1 = arith.constant 0 : i32
    return %c0_i32, %c0_i32_0 : i32, i32
  }
  func.func @transform_3(%arg0: i32, %arg1: i32) -> (i32, i32) {
    %c0_i32 = arith.constant 0 : i32
    %c0_i32_0 = arith.constant 0 : i32
    %c0_i32_1 = arith.constant 0 : i32
    return %c0_i32, %c0_i32_0 : i32, i32
  }
  func.func @transform_4(%arg0: i32, %arg1: i32) -> (i32, i32) {
    %c0_i32 = arith.constant 0 : i32
    %c0_i32_0 = arith.constant 0 : i32
    %c0_i32_1 = arith.constant 0 : i32
    return %c0_i32, %c0_i32_0 : i32, i32
  }
  func.func @transform_5(%arg0: i32, %arg1: i32) -> (i32, i32) {
    %c0_i32 = arith.constant 0 : i32
    %c0_i32_0 = arith.constant 0 : i32
    %c0_i32_1 = arith.constant 0 : i32
    return %c0_i32, %c0_i32_0 : i32, i32
  }
  func.func @transform_6(%arg0: i32, %arg1: i32) -> (i32, i32, i32) {
    %c0_i32 = arith.constant 0 : i32
    %c0_i32_0 = arith.constant 0 : i32
    %c0_i32_1 = arith.constant 0 : i32
    return %arg1, %c0_i32, %c0_i32_0 : i32, i32, i32
  }
  func.func @transform_7(%arg0: i32, %arg1: i32) -> (i32, i32, i32) {
    %c0_i32 = arith.constant 0 : i32
    %c0_i32_0 = arith.constant 0 : i32
    %c0_i32_1 = arith.constant 0 : i32
    return %arg1, %c0_i32, %c0_i32_0 : i32, i32, i32
  }
  func.func @transform_8(%arg0: i32, %arg1: i32) -> (i32, i32, i32) {
    %c0_i32 = arith.constant 0 : i32
    %c0_i32_0 = arith.constant 0 : i32
    %c0_i32_1 = arith.constant 0 : i32
    return %arg1, %c0_i32, %c0_i32_0 : i32, i32, i32
  }
  func.func @transform_9(%arg0: i32, %arg1: i32) -> (i32, i32, i32) {
    %c0_i32 = arith.constant 0 : i32
    %c0_i32_0 = arith.constant 0 : i32
    %c0_i32_1 = arith.constant 0 : i32
    return %arg1, %c0_i32, %c0_i32_0 : i32, i32, i32
  }
  func.func @transform_10(%arg0: i32, %arg1: i32) -> (i32, i32, i32) {
    %c0_i32 = arith.constant 0 : i32
    %c0_i32_0 = arith.constant 0 : i32
    %c0_i32_1 = arith.constant 0 : i32
    return %arg1, %c0_i32, %c0_i32_0 : i32, i32, i32
  }
  func.func @transform_11(%arg0: i32, %arg1: i32) -> (i32, i32, i32) {
    %c0_i32 = arith.constant 0 : i32
    %c0_i32_0 = arith.constant 0 : i32
    %c0_i32_1 = arith.constant 0 : i32
    return %arg1, %c0_i32, %c0_i32_0 : i32, i32, i32
  }
  func.func @transform_12(%arg0: i32, %arg1: i32) -> (i32, i32, i32) {
    %c0_i32 = arith.constant 0 : i32
    %c0_i32_0 = arith.constant 0 : i32
    %c0_i32_1 = arith.constant 0 : i32
    return %arg1, %c0_i32, %c0_i32_0 : i32, i32, i32
  }
  func.func @transform_13(%arg0: i32, %arg1: i32) -> (i32, i32, i32) {
    %c0_i32 = arith.constant 0 : i32
    %c0_i32_0 = arith.constant 0 : i32
    %c0_i32_1 = arith.constant 0 : i32
    return %arg1, %c0_i32, %c0_i32_0 : i32, i32, i32
  }
  func.func @transform_14(%arg0: i32, %arg1: i32) -> (i32, i32, i32) {
    %c0_i32 = arith.constant 0 : i32
    %c0_i32_0 = arith.constant 0 : i32
    %c0_i32_1 = arith.constant 0 : i32
    return %arg1, %c0_i32, %c0_i32_0 : i32, i32, i32
  }
  func.func @transform_15(%arg0: i32, %arg1: i32) -> (i32, i32, i32) {
    %c0_i32 = arith.constant 0 : i32
    %c0_i32_0 = arith.constant 0 : i32
    %c0_i32_1 = arith.constant 0 : i32
    return %arg1, %c0_i32, %c0_i32_0 : i32, i32, i32
  }
  func.func @transform_16(%arg0: i32, %arg1: i32) -> (i32, i32, i32) {
    %c0_i32 = arith.constant 0 : i32
    %c0_i32_0 = arith.constant 0 : i32
    %c0_i32_1 = arith.constant 0 : i32
    return %arg1, %c0_i32, %c0_i32_0 : i32, i32, i32
  }
  func.func @transform_17(%arg0: i32, %arg1: i32) -> (i32, i32, i32) {
    %c0_i32 = arith.constant 0 : i32
    %c0_i32_0 = arith.constant 0 : i32
    %c0_i32_1 = arith.constant 0 : i32
    return %arg1, %c0_i32, %c0_i32_0 : i32, i32, i32
  }
  func.func @transform_18(%arg0: i32, %arg1: i32) -> (i32, i32) {
    %c0_i32 = arith.constant 0 : i32
    %c0_i32_0 = arith.constant 0 : i32
    %c0_i32_1 = arith.constant 0 : i32
    return %c0_i32, %c0_i32_0 : i32, i32
  }
  func.func @transform_19(%arg0: i32, %arg1: i32) -> (i32, i32) {
    %c0_i32 = arith.constant 0 : i32
    %c0_i32_0 = arith.constant 0 : i32
    %c0_i32_1 = arith.constant 0 : i32
    return %c0_i32, %c0_i32_0 : i32, i32
  }
  func.func @transform_20(%arg0: i32, %arg1: i32) -> (i32, i32, i32) {
    %c0_i32 = arith.constant 0 : i32
    %c0_i32_0 = arith.constant 0 : i32
    %c0_i32_1 = arith.constant 0 : i32
    return %arg0, %c0_i32, %c0_i32_0 : i32, i32, i32
  }
}

</mosaic_0001>

<bundles_post_ra>
// kernel: tpu_custom_call.1
= control target key start
LH: loop header
LB: loop body
LE: loop exit
PB: predicated region body
PF: predicated region fallthrough
CT: control target
= control target key end

     0   :  { %s4327_s0 = inlined_call_operand.vmem [shape: f32[2,8,16], index: 0, kind: input, shape index: {}]   ;;  %s4328_s1 = inlined_call_operand.vmem [shape: bf16[16,32], index: 1, kind: input, shape index: {}]   ;;  %s4329_s2 = inlined_call_operand.vmem [shape: f32[1,32], index: 2, kind: input, shape index: {}]   ;;  %s4330_s3 = inlined_call_operand.vmem [shape: f32[1,32], index: 3, kind: input, shape index: {}]   ;;  %s4331_s4 = inlined_call_operand.vmem [shape: f32[1,32], index: 4, kind: input, shape index: {}]   ;;  %s4332_s5 = inlined_call_operand.vmem [shape: f32[8,32], index: 5, kind: input, shape index: {}]   ;;  %s4333_s6 = inlined_call_operand.vmem [shape: f32[2,1,32], index: 6, kind: input, shape index: {}]   ;;  %s4334_s7 = inlined_call_operand.vmem [shape: f32[2,1,32], index: 7, kind: input, shape index: {}]   ;;  %s4335_s8 = inlined_call_operand.vmem [shape: bf16[2,32,96], index: 8, kind: input, shape index: {}]   ;;  %s4336_s9 = inlined_call_operand.vmem [shape: f32[2,1,96], index: 9, kind: input, shape index: {}]   ;;  %s4337_s10 = inlined_call_operand.vmem [shape: bf16[2,32,32], index: 10, kind: input, shape index: {}]   ;;  %s4338_s11 = inlined_call_operand.vmem [shape: f32[2,1,32], index: 11, kind: input, shape index: {}]   ;;  %s4339_s12 = inlined_call_operand.vmem [shape: f32[2,1,32], index: 12, kind: input, shape index: {}]   ;;  %s4340_s13 = inlined_call_operand.vmem [shape: f32[2,1,32], index: 13, kind: input, shape index: {}]   ;;  %s4341_s14 = inlined_call_operand.vmem [shape: bf16[2,32,128], index: 14, kind: input, shape index: {}]   ;;  %s4342_s15 = inlined_call_operand.vmem [shape: f32[2,1,128], index: 15, kind: input, shape index: {}]   ;;  %s4343_s16 = inlined_call_operand.vmem [shape: bf16[2,128,32], index: 16, kind: input, shape index: {}]   ;;  %s4344_s17 = inlined_call_operand.vmem [shape: f32[2,1,32], index: 17, kind: input, shape index: {}]   ;;  %s4345_s18 = inlined_call_operand.vmem [shape: f32[1,32], index: 18, kind: input, shape index: {}]   ;;  %s4346_s19 = inlined_call_operand.vmem [shape: f32[1,32], index: 19, kind: input, shape index: {}]   ;;  %s4347_s20 = inlined_call_operand.hbm [shape: f32[2,8,32], index: 20, kind: output, shape index: {}]  }
   0x1   :  { %4363 = sst [smem:[#allocation19_spill]] %s4327_s0 }
   0x2   :  { %4364 = sst [smem:[#allocation20_spill]] %s4328_s1 }
   0x3   :  { %4365 = sst [smem:[#allocation21_spill]] %s4329_s2 }
   0x4   :  { %4366 = sst [smem:[#allocation22_spill]] %s4330_s3 }
   0x5   :  { %4367 = sst [smem:[#allocation23_spill]] %s4331_s4 }
   0x6   :  { %4368 = sst [smem:[#allocation24_spill]] %s4332_s5 }
   0x7   :  { %4369 = sst [smem:[#allocation25_spill]] %s4334_s7 }
   0x8   :  { %4370 = sst [smem:[#allocation26_spill]] %s4335_s8 }
   0x9   :  { %4371 = sst [smem:[#allocation27_spill]] %s4337_s10 }
   0xa   :  { %4372 = sst [smem:[#allocation28_spill]] %s4345_s18 }
   0xb   :  { %4373 = sst [smem:[#allocation29_spill]] %s4346_s19 }
   0xc   :  { %4374 = sst [smem:[#allocation30_spill]] %s4347_s20 }
   0xd   :  { %25 = vsyncpa [#allocation4], 0 }
   0xe   :  { %27 = vsyncpa [#allocation4 + $0x1], 0  ;;  %s3690_s1 = smov 0   ;;  %s3692_s22 = smov 0  }
   0xf   :  { %s3694_s23 = smov 0   ;;  %s3696_s24 = smov 0  }
  0x10   :  { %s3698_s2 = smov 0   ;;  %s3700_s25 = smov 0  }
  0x11   :  { %s3702_s3 = smov 0   ;;  %s3704_s26 = smov 0  }
  0x12 LB: > { %4375 = sst [smem:[#allocation6_spill]] %s3540_s1  ;;  %s3142_s27 = sadd.s32 4294967295, %s3568_s26   ;;  %s3568_s26 = sphi %s3704_s26, %s33_s26   ;;  %s3564_s3 = sphi %s3702_s3, %s4423_s3   ;;  %s3560_s25 = sphi %s3700_s25, %s4422_s25   ;;  %s3556_s2 = sphi %s3698_s2, %s4421_s2   ;;  %s3552_s24 = sphi %s3696_s24, %s4420_s24   ;;  %s3548_s23 = sphi %s3694_s23, %s4419_s23   ;;  %s3544_s22 = sphi %s3692_s22, %s4418_s22   ;;  %s3540_s1 = sphi %s3690_s1, %s4417_s1  }
  0x13   : > { %4376 = sst [smem:[#allocation7_spill]] %s3544_s22  ;;  %s3143_s28 = sadd.s32 4294967294, %s3568_s26  }
  0x14   : > { %4377 = sst [smem:[#allocation8_spill]] %s3548_s23  ;;  %s42_s4 = sadd.s32 1, %s3560_s25 }
  0x15   : > { %4378 = sst [smem:[#allocation9_spill]] %s3552_s24  ;;  %p43_p0 = scmp.ge.s32.totalorder %s42_s4, 2 }
  0x16   : > { %4379 = sst [smem:[#allocation10_spill]] %s3556_s2  ;;  %s45_s29 = sadd.s32 1, %s3564_s3 }
  0x17   : > { %4380 = sst [smem:[#allocation11_spill]] %s3560_s25  ;;  %p547_p1 = scmp.ne.s32.totalorder %s3548_s23, %s3544_s22 }
  0x18   : > { %4381 = sst [smem:[#allocation12_spill]] %s3564_s3  ;;  %p548_p2 = scmp.eq.s32.totalorder %s3142_s27, 3 }
  0x19   : > { %4382 = sst [smem:[#allocation13_spill]] %s3568_s26  ;;  %s4425_s4 = smov (%p43_p0, %s42_s4), 0 }
  0x1a   : > { %4383 = sst [smem:[#allocation14_spill]] %s4425_s4  ;;  %s4427_s29 = smov (!%p43_p0, %s45_s29), %s3564_s3 }
  0x1b   : > { %p3739_p3 = por %p548_p2, %p547_p1  ;;  %p553_p4 = scmp.ne.s32.totalorder %s3544_s22, %s3540_s1 }
  0x1c   : > { %p47_p5 = scmp.ge.s32.totalorder %s4427_s29, 2  ;;  %p554_p6 = scmp.eq.s32.totalorder %s3143_s28, 3 }
  0x1d   : > { %s4384_s30 = scalar_select %p3739_p3, 1, 0 }
  0x1e   : > { %p3146_p7 = scmp.ge.s32.totalorder %s3568_s26, 1  ;;  %p680_p8 = scmp.lt.s32.totalorder %s3568_s26, 5 }
  0x1f   : > { %4385 = sst [smem:[#allocation15_spill]] %s4384_s30  ;;  %s4429_s29 = smov (%p47_p5, %s4427_s29), 0 }
  0x20   : > { %4386 = sst [smem:[#allocation16_spill]] %s4429_s29  ;;  %p3749_p9 = por %p554_p6, %p553_p4 }
  0x21   : > { %p681_p10 = pnand %p3146_p7, %p680_p8  ;;  %s534_s21 = ssub.s32 %s3564_s3, %s4429_s29 }
  0x22   : > { %s4387_s0 = scalar_select %p3749_p9, 1, 0 }
  0x23   : > { %s537_s27 = sadd.s32 1, %s3548_s23  ;;  %p535_p11 = scmp.eq.s32.totalorder %s534_s21, 0 }
  0x24   : > { %4388 = sst [smem:[#allocation17_spill]] %s4387_s0  ;;  %684 = sbr.rel (%p681_p10) target bundleno = 3289 (0xcd9), region = 100 }
  0x25   : > { %s3757_s4 = scalar_select %p535_p11, %s3548_s23, %s537_s27  }
  0x26   : > { %s4353_s28 = sand.u32 (!%p681_p10), 1, %s3544_s22   ;;  %p781_p12 = scmp.lt.s32.totalorder (!%p681_p10), %s3556_s2, 1 }
  0x27   : > { %4389 = sst [smem:[#allocation18_spill]] %s3757_s4  ;;  %s3763_s25 = sshll.u32 (!%p681_p10), %s4353_s28, 3 }
  0x28   : > { %p785_p13 = scmp.lt.s32.totalorder (!%p681_p10), %s3552_s24, 1  ;;  %s4390_s3 = sld [smem:[#allocation19_spill]] (!%p681_p10) }
  0x29   : > { %s4392_s8 = sld [smem:[#allocation26_spill]] (!%p681_p10)  ;;  %s4393_s10 = sld [smem:[#allocation27_spill]] (!%p681_p10) }
  0x2a   : > { %s780_s18 = scalar_lea.vmem (!%p681_p10), [#allocation3], %s3763_s25  ;;  %s4394_s19 = sld [smem:[#allocation9_spill]] (!%p681_p10) }
  0x2b   : > { %s782_s0 = scalar_select %p781_p12, %s3556_s2, 1 }
  0x2c   : > { %s3768_s1 = scalar_select %p785_p13, %s3552_s24, 1 }
  0x2d   : > { %s3148_s21 = sshll.u32 %s782_s0, 3 }
  0x2e   : > { %s784_s28 = scalar_lea.vmem %s4390_s3, %s3148_s21  ;;  %s3204_s2 = sshll.u32 %s3768_s1, 4 }
  0x2f   : > { %s3785_s5 = scalar_lea.vmem %s4392_s8, %s3204_s2  ;;  %s3794_s21 = scalar_lea.vmem %s4393_s10, %s3204_s2 }
  0x30   : > { %s812_s8 = scalar_lea.vmem %s4340_s13, %s3768_s1  ;;  %s3811_s0 = scalar_lea.vmem %s4341_s14, %s3204_s2 }
  0x31   : > { %s820_s29 = scalar_lea.vmem %s4342_s15, %s3768_s1  ;;  %s3207_s10 = sshll.u32 %s3768_s1, 6 }
  0x32   : > { %s828_s20 = scalar_lea.vmem %s4344_s17, %s3768_s1  ;;  %s3825_s26 = scalar_lea.vmem %s4343_s16, %s3207_s10 }
  0x33   : > { %p3157_p0 = scmp.ne.s32.totalorder %s4394_s19, 0 }
  0x34   : > { %s4395_s24 = sld [smem:[#allocation20_spill]] (!%p3157_p0)  ;;  %v3570_v1 = vmov (!%p3157_p0), 0.0   ;;  %v834_v2 = vld [vmem:[%s784_s28] sm:$0xff] (!%p3157_p0)  ;;  %vm3571_vm0 = vmmov (!%p3157_p0), 0   ;;  %vm851_vm1 = vcmask (!%p3157_p0), 130048   ;;  %s4396_s3 = sld [smem:[#allocation21_spill]] (!%p3157_p0) }
  0x35   : > { %833 = sbr.rel (%p3157_p0) target bundleno = 449 (0x1c1), region = 104  ;;  %3245 = vmatprep.subr.bf16.mxu0 (!%p3157_p0), %v3570_v1  ;;  %3247 = vmatprep.mubr.msk.bf16.mxu0 (!%p3157_p0), %vm3571_vm0, %v3570_v1  ;;  %v835_v3 = vpack.c.bf16 (!%p3157_p0), %v834_v2, %v834_v2  ;;  %vm897_vm2 = vcmask (!%p3157_p0), 261120   ;;  %s4397_s4 = sld [smem:[#allocation22_spill]] (!%p3157_p0) }
  0x36   : > { %s4398_s19 = sld [smem:[#allocation23_spill]] (!%p3157_p0) }
  0x3a   : > { %v3432_v0 = vld [vmem:[%s4395_s24] sm:$0xff] (!%p3157_p0)   ;;  %s4399_s24 = sld [smem:[#allocation24_spill]] (!%p3157_p0) }
  0x3b   : > { %3246 = vmatpush3.bf16.msra.mxu0 (!%p3157_p0), %v3432_v0  ;;  %v3158_v4 = vld [vmem:[%s4396_s3] ss:$0 sm:$0xff] (!%p3157_p0) }
  0x3c   : > { %v3161_v22 = vld [vmem:[%s4397_s4] ss:$0 sm:$0xff] }
  0x3d   : > { %v3162_v24 = vld [vmem:[%s4398_s19] ss:$0 sm:$0xff] }
  0x3e   : > { %3248 = vmatmul.mubr.msk.bf16.vlgmr.msra.gmra.mrb[0].mxu0 %vm851_vm1, %v835_v3 }
  0x40   : > { %v928_v26 = vld [vmem:[%s4399_s24] sm:$0xff] }
 0x111   : > { %v889_v5 = vpop.f32.mrb[0].mxu0 }
 0x112   : > { %v890_v6 = vadd.f32 %v3158_v4, %v889_v5  ;;  %v3249_v7 = vpop.f32.mrb[1].mxu0 }
 0x113   : > { %v892_v8 = vpop.f32.mrb[2].mxu0 }
 0x114   : > { %v3250_v9 = vpop.f32.mrb[3].mxu0  ;;  %v898_v10 = vsel %vm897_vm2, %v890_v6, 0.0  ;;  %v903_v11 = vmul.f32 %v890_v6, %v890_v6 }
 0x115   : > { %899 = vadd.xlane.f32.xlu0 %v898_v10 }
 0x116   : > { %v904_v12 = vsel %vm897_vm2, %v903_v11, 0.0 }
 0x119   : > { %905 = vadd.xlane.f32.xlu0 %v904_v12 }
 0x1a2   : > { %v900_v13 = vpop.xlane.xlu0 %899 }
 0x1a3   : > { %v902_v14 = vmul.f32 0.03125, %v900_v13 }
 0x1a5   : > { %v908_v16 = vmul.f32 %v902_v14, %v902_v14  ;;  %v910_v20 = vsub.f32 %v890_v6, %v902_v14 }
 0x1a6   : > { %v906_v15 = vpop.xlane.xlu0 %905 }
 0x1a7   : > { %v907_v17 = vmul.f32 0.03125, %v906_v15 }
 0x1a9   : > { %v909_v18 = vsub.f32 %v907_v17, %v908_v16 }
 0x1ab   : > { %v911_v19 = vadd.f32 1e-05, %v909_v18 }
 0x1ad   : > { %3433 = vrsqrt.f32 %v911_v19 }
 0x1b7   : > { %v3434_v21 = vpop.eup %3433 }
 0x1b8   : > { %v913_v23 = vmul.f32 %v3434_v21, %v910_v20 }
 0x1ba   : > { %v920_v25 = vmul.f32 %v3161_v22, %v913_v23 }
 0x1bc   : > { %v927_v27 = vadd.f32 %v3162_v24, %v920_v25 }
 0x1be   : > { %v929_v28 = vadd.f32 %v928_v26, %v927_v27 }
 0x1c0   : > { %930 = vst.msk [vmem:[#allocation2] sm:$0xff] %vm897_vm2, %v929_v28 }
 0x1c1 PF: > { %vm934_vm3 = vcmask 261120   ;;  %v3435_v33 = vld [vmem:[%s3785_s5] sm:$0xff]   ;;  %v3572_v34 = vmov 0.0   ;;  %vm3573_vm4 = vmmov 0   ;;  %v3436_v35 = vld [vmem:[%s3785_s5 + $0x8] sm:$0xff]   ;;  %s4400_s10 = scalar_lea.vmem %s4333_s6, %s3768_s1  ;;  %s4401_s23 = sld [smem:[#allocation25_spill]]  ;;  %v1039_v61 = vlaneseq }
 0x1c2   : > { %3251 = vmatprep.subr.bf16.mxu1 %v3572_v34  ;;  %3255 = vmatprep.mubr.msk.bf16.mxu1 %vm3573_vm4, %v3572_v34  ;;  %v3163_v45 = vld [vmem:[%s4400_s10] ss:$0 sm:$0xff]  ;;  %s4403_s19 = scalar_lea.vmem %s4336_s9, %s3768_s1  ;;  %s3574_s7 = smov 120   ;;  %v3578_v59 = vmov 1983009808   ;;  %v3580_v7 = vmov 0  }
 0x1c3   : > { %3252 = vmatpush3.bf16.msra.mxu1 %v3435_v33  ;;  %3277 = vmatprep.subr.bf16.mxu0 %v3572_v34  ;;  %v3165_v51 = vld [vmem:[%s4403_s19] ss:$0 sm:$0xff]  ;;  %s3575_s2 = smov 96   ;;  %s3576_s24 = smov 64   ;;  %v1037_v60 = vunpack.c.l.s4 %v3578_v59  ;;  %v1040_v63 = vshrl.u32 %v1039_v61, 7  ;;  %vm1451_vm5 = vcmask 64512  }
 0x1c4   : > { %3253 = vmatprep.subr.bf16.mxu1 %v3572_v34  ;;  %3279 = vmatprep.mubr.msk.bf16.mxu0 %vm3573_vm4, %v3572_v34  ;;  %s3577_s5 = smov 80   ;;  %v3579_v0 = vmov 1934713408   ;;  %vm1567_vm6 = vcmask 1043456   ;;  %s3581_s27 = smov 112   ;;  %vm2581_vm7 = vcmask 130048  }
 0x1c5   : > { %v1038_v62 = vunpack.c.0.s8 %v1037_v60  ;;  %v1045_v1 = vunpack.c.l.s4 %v3579_v0  ;;  %s3582_s10 = smov 48   ;;  %s3583_s3 = smov 8  }
 0x1c7   : > { %v931_v29 = vld [vmem:[#allocation2] sm:$0xff]  ;;  %3254 = vmatpush3.bf16.msra.mxu1 %v3436_v35  ;;  %s4402_s4 = scalar_lea.vmem %s4401_s23, %s3768_s1  ;;  %v3888_v2 = vsub.s32 %v1038_v62, %v1040_v63  ;;  %v1046_v5 = vunpack.c.0.s8 %v1045_v1  ;;  %s4404_s23 = scalar_lea.vmem %s4338_s11, %s3768_s1 }
 0x1c8   : > { %v935_v30 = vsel %vm934_vm3, %v931_v29, 0.0  ;;  %v940_v31 = vmul.f32 %v931_v29, %v931_v29  ;;  %3259 = vmatprep.subr.bf16.mxu1 %v3572_v34  ;;  %v3164_v47 = vld [vmem:[%s4402_s4] ss:$0 sm:$0xff] }
 0x1c9   : > { %936 = vadd.xlane.f32.xlu0 %v935_v30  ;;  %v3895_v9 = vsub.s32 %v1046_v5, %v1040_v63 }
 0x1ca   : > { %v941_v32 = vsel %vm934_vm3, %v940_v31, 0.0 }
 0x1cd   : > { %942 = vadd.xlane.f32.xlu0 %v941_v32 }
 0x256   : > { %v937_v36 = vpop.xlane.xlu0 %936 }
 0x257   : > { %v939_v37 = vmul.f32 0.03125, %v937_v36 }
 0x259   : > { %v945_v39 = vmul.f32 %v939_v37, %v939_v37  ;;  %v947_v43 = vsub.f32 %v931_v29, %v939_v37 }
 0x25a   : > { %v943_v38 = vpop.xlane.xlu0 %942 }
 0x25b   : > { %v944_v40 = vmul.f32 0.03125, %v943_v38 }
 0x25d   : > { %v946_v41 = vsub.f32 %v944_v40, %v945_v39 }
 0x25f   : > { %v948_v42 = vadd.f32 1e-05, %v946_v41 }
 0x261   : > { %3449 = vrsqrt.f32 %v948_v42 }
 0x26b   : > { %v3450_v44 = vpop.eup %3449 }
 0x26c   : > { %v950_v46 = vmul.f32 %v3450_v44, %v947_v43 }
 0x26e   : > { %v957_v48 = vmul.f32 %v3163_v45, %v950_v46 }
 0x270   : > { %v964_v49 = vadd.f32 %v3164_v47, %v957_v48 }
 0x272   : > { %v965_v50 = vpack.c.bf16 %v964_v49, %v964_v49 }
 0x274   : > { %3256 = vmatmul.mubr.msk.bf16.vlgmr.msra.gmra.mrb[0].mxu1 %vm934_vm3, %v965_v50 }
 0x275   : > { %3261 = vmatprep.mubr.msk.bf16.mxu1 %vm3573_vm4, %v3572_v34 }
 0x347   : > { %v1026_v52 = vpop.f32.mrb[0].mxu1 }
 0x348   : > { %v1027_v53 = vadd.f32 %v3165_v51, %v1026_v52  ;;  %v3257_v54 = vpop.f32.mrb[1].mxu1 }
 0x349   : > { %v1029_v55 = vpop.f32.mrb[2].mxu1 }
 0x34a   : > { %v3877_v56 = vpack.c.bf16 %v1027_v53, %v1027_v53  ;;  %v3258_v57 = vpop.f32.mrb[3].mxu1 }
 0x34c   : > { %1034 = vrot.lane.b32.xlu1 %v3877_v56, %s3574_s7  ;;  %v1042_v6 = vrot.slane %v3877_v56, %v3888_v2 }
 0x34e   : > { %v1043_v10 = vcombine.high %v1042_v6, %v3580_v7  ;;  %v3906_v15 = vrot.slane %v1042_v6, %v3895_v9 }
 0x350   : > { %1171 = vrot.lane.b32.xlu1 %v3877_v56, %s3575_s2  ;;  %v3910_v17 = vrot.slane %v1043_v10, %v3895_v9  ;;  %v1058_v21 = vcombine.high %v3906_v15, %v3580_v7  ;;  %v1089_v28 = vshrl.u32 %v3906_v15, 16 }
 0x352   : > { %v1059_v25 = vcombine.high %v3910_v17, %v3580_v7  ;;  %v1097_v36 = vshrl.u32 %v1058_v21, 16  ;;  %v1105_v37 = vshrl.u32 %v3910_v17, 16 }
 0x354   : > { %1311 = vrot.lane.b32.xlu1 %v3877_v56, %s3576_s24  ;;  %v1113_v41 = vshrl.u32 %v1059_v25, 16 }
 0x358   : > { %1944 = vrot.lane.b32.xlu1 %v3877_v56, %s3577_s5 }
 0x3be   : > { %v3884_v58 = vpop.permute.xlu1 %1034 }
 0x3bf   : > { %1313 = vrot.lane.b32.xlu1 %v3884_v58, %s3576_s24  ;;  %1173 = vrot.lane.b32.xlu0 %v3884_v58, %s3575_s2  ;;  %v1067_v3 = vrot.slane %v3884_v58, %v3888_v2  ;;  %s4406_s2 = sld [smem:[#allocation9_spill]] }
 0x3c1   : > { %v1068_v8 = vcombine.high %v1067_v3, %v3580_v7  ;;  %v3900_v13 = vrot.slane %v1067_v3, %v3895_v9 }
 0x3c2   : > { %v1172_v4 = vpop.permute.xlu1 %1171 }
 0x3c3   : > { %v1182_v11 = vrot.slane %v1172_v4, %v3888_v2  ;;  %v3903_v14 = vrot.slane %v1068_v8, %v3895_v9  ;;  %v1083_v19 = vcombine.high %v3900_v13, %v3580_v7  ;;  %v1090_v26 = vshrl.u32 %v3900_v13, 16 }
 0x3c4   : > { %v1087_v38 = vpack.i.b16 %v3900_v13, %v3906_v15 }
 0x3c5   : > { %v1183_v18 = vcombine.high %v1182_v11, %v3580_v7  ;;  %v1084_v20 = vcombine.high %v3903_v14, %v3580_v7  ;;  %v3920_v22 = vrot.slane %v1182_v11, %v3895_v9  ;;  %v1098_v27 = vshrl.u32 %v1083_v19, 16  ;;  %p3197_p1 = scmp.ne.s32.totalorder %s4406_s2, 1 }
 0x3c6   : > { %v1312_v12 = vpop.permute.xlu1 %1311  ;;  %v1106_v29 = vshrl.u32 %v3903_v14, 16  ;;  %v3946_v42 = vpack.i.b16 %v1090_v26, %v1089_v28  ;;  %v1095_v43 = vpack.i.b16 %v1083_v19, %v1058_v21  ;;  %v1103_v44 = vpack.i.b16 %v3903_v14, %v3910_v17  ;;  %s4407_s24 = sld [smem:[#allocation28_spill]] (!%p3197_p1) }
 0x3c7   : > { %v1322_v16 = vrot.slane %v1312_v12, %v3888_v2  ;;  %v3924_v24 = vrot.slane %v1183_v18, %v3895_v9  ;;  %v1114_v30 = vshrl.u32 %v1084_v20, 16  ;;  %v1198_v33 = vcombine.high %v3920_v22, %v3580_v7 }
 0x3c8   : > { %v1111_v40 = vpack.i.b16 %v1084_v20, %v1059_v25  ;;  %v3950_v45 = vpack.i.b16 %v1098_v27, %v1097_v36  ;;  %v1229_v46 = vshrl.u32 %v3920_v22, 16  ;;  %v3955_v50 = vpack.i.b16 %v1106_v29, %v1105_v37 }
 0x3c9   : > { %v1323_v23 = vcombine.high %v1322_v16, %v3580_v7  ;;  %v3932_v31 = vrot.slane %v1322_v16, %v3895_v9  ;;  %v1199_v39 = vcombine.high %v3924_v24, %v3580_v7  ;;  %v3957_v51 = vpack.i.b16 %v1114_v30, %v1113_v41 }
 0x3ca   : > { %v3934_v32 = vpop.permute.xlu1 %1944  ;;  %v1237_v52 = vshrl.u32 %v1198_v33, 16  ;;  %v1245_v57 = vshrl.u32 %v3924_v24, 16  ;;  %v3965_v61 = vcombine.low %v1095_v43, %v1111_v40  ;;  %v1141_v5 = vcombine.low %v3946_v42, %v3955_v50 }
 0x3cb   : > { %v3939_v35 = vrot.slane %v1323_v23, %v3895_v9  ;;  %v1338_v47 = vcombine.high %v3932_v31, %v3580_v7  ;;  %v1253_v59 = vshrl.u32 %v1199_v39, 16  ;;  %v1369_v60 = vshrl.u32 %v3932_v31, 16 }
 0x3cc   : > { %v1149_v6 = vcombine.low %v3950_v45, %v3957_v51 }
 0x3cd   : > { %v1339_v53 = vcombine.high %v3939_v35, %v3580_v7  ;;  %v1377_v3 = vshrl.u32 %v1338_v47, 16  ;;  %v1385_v4 = vshrl.u32 %v3939_v35, 16 }
 0x3cf   : > { %v1393_v8 = vshrl.u32 %v1339_v53, 16 }
 0x431   : > { %v1174_v48 = vpop.permute.xlu0 %1173  ;;  %v1314_v49 = vpop.permute.xlu1 %1313 }
 0x432   : > { %v1207_v54 = vrot.slane %v1174_v48, %v3888_v2  ;;  %v1347_v55 = vrot.slane %v1314_v49, %v3888_v2 }
 0x434   : > { %v1208_v62 = vcombine.high %v1207_v54, %v3580_v7  ;;  %v1215_v63 = vrot.slane %v1207_v54, %v3895_v9  ;;  %v1348_v0 = vcombine.high %v1347_v55, %v3580_v7  ;;  %v1355_v1 = vrot.slane %v1347_v55, %v3895_v9 }
 0x436   : > { %v1222_v10 = vrot.slane %v1208_v62, %v3895_v9  ;;  %v1223_v11 = vcombine.high %v1215_v63, %v3580_v7  ;;  %v1230_v12 = vshrl.u32 %v1215_v63, 16  ;;  %v1227_v16 = vpack.i.b16 %v1215_v63, %v3920_v22 }
 0x437   : > { %v1362_v18 = vrot.slane %v1348_v0, %v3895_v9  ;;  %v1363_v19 = vcombine.high %v1355_v1, %v3580_v7  ;;  %v1367_v20 = vpack.i.b16 %v1355_v1, %v3932_v31  ;;  %v1370_v26 = vshrl.u32 %v1355_v1, 16 }
 0x438   : > { %v1224_v21 = vcombine.high %v1222_v10, %v3580_v7  ;;  %v1231_v23 = vpack.i.b16 %v1230_v12, %v1229_v46  ;;  %v1238_v25 = vshrl.u32 %v1223_v11, 16  ;;  %v1235_v27 = vpack.i.b16 %v1223_v11, %v1198_v33 }
 0x439   : > { %v1243_v28 = vpack.i.b16 %v1222_v10, %v3924_v24  ;;  %v1246_v29 = vshrl.u32 %v1222_v10, 16  ;;  %v1364_v30 = vcombine.high %v1362_v18, %v3580_v7  ;;  %v1375_v40 = vpack.i.b16 %v1363_v19, %v1338_v47 }
 0x43a   : > { %v1239_v36 = vpack.i.b16 %v1238_v25, %v1237_v52  ;;  %v1251_v37 = vpack.i.b16 %v1224_v21, %v1199_v39  ;;  %v1254_v22 = vshrl.u32 %v1224_v21, 16  ;;  %v1378_v43 = vshrl.u32 %v1363_v19, 16 }
 0x43b   : > { %v1247_v41 = vpack.i.b16 %v1246_v29, %v1245_v57  ;;  %v1257_v42 = vcombine.low %v1227_v16, %v1243_v28  ;;  %v1383_v31 = vpack.i.b16 %v1362_v18, %v3939_v35  ;;  %v1386_v46 = vshrl.u32 %v1362_v18, 16 }
 0x43c   : > { %v1255_v45 = vpack.i.b16 %v1254_v22, %v1253_v59  ;;  %v1265_v48 = vcombine.low %v1235_v27, %v1251_v37  ;;  %v1391_v49 = vpack.i.b16 %v1364_v30, %v1339_v53  ;;  %v1371_v24 = vpack.i.b16 %v1370_v26, %v1369_v60 }
 0x43d   : > { %v1264_v33 = vrot.slane %v1257_v42, %v3888_v2  ;;  %v1281_v50 = vcombine.low %v1231_v23, %v1247_v41  ;;  %v1394_v51 = vshrl.u32 %v1364_v30, 16  ;;  %v1387_v55 = vpack.i.b16 %v1386_v46, %v1385_v4 }
 0x43e   : > { %v1289_v54 = vcombine.low %v1239_v36, %v1255_v45  ;;  %v1397_v52 = vcombine.low %v1367_v20, %v1383_v31  ;;  %v1405_v39 = vcombine.low %v1375_v40, %v1391_v49  ;;  %v1379_v62 = vpack.i.b16 %v1378_v43, %v1377_v3 }
 0x43f   : > { %v1395_v47 = vpack.i.b16 %v1394_v51, %v1393_v8  ;;  %v1272_v57 = vrot.slane %v1265_v48, %v3888_v2  ;;  %v1288_v63 = vrot.slane %v1281_v50, %v3888_v2  ;;  %v1421_v35 = vcombine.low %v1371_v24, %v1387_v55 }
 0x440   : > { %v1296_v59 = vrot.slane %v1289_v54, %v3888_v2  ;;  %v1404_v53 = vrot.slane %v1397_v52, %v3888_v2  ;;  %v1412_v0 = vrot.slane %v1405_v39, %v3888_v2  ;;  %v1117_v3 = vcombine.low %v1087_v38, %v1103_v44 }
 0x441   : > { %v1273_v1 = vcombine.low %v1264_v33, %v1272_v57  ;;  %v1429_v60 = vcombine.low %v1379_v62, %v1395_v47  ;;  %v1156_v4 = vrot.slane %v1149_v6, %v3888_v2  ;;  %v1428_v8 = vrot.slane %v1421_v35, %v3888_v2 }
 0x442   : > { %v1297_v10 = vcombine.low %v1288_v63, %v1296_v59  ;;  %v1413_v11 = vcombine.low %v1404_v53, %v1412_v0  ;;  %v1132_v19 = vrot.slane %v3965_v61, %v3888_v2  ;;  %v1148_v20 = vrot.slane %v1141_v5, %v3888_v2 }
 0x443   : > { %v1436_v12 = vrot.slane %v1429_v60, %v3888_v2  ;;  %v1280_v16 = vrot.slane %v1273_v1, %v3895_v9  ;;  %v1124_v17 = vrot.slane %v1117_v3, %v3888_v2  ;;  %v1955_v52 = vrot.slane %v3934_v32, %v3888_v2 }
 0x444   : > { %v1304_v18 = vrot.slane %v1297_v10, %v3895_v9  ;;  %v1420_v14 = vrot.slane %v1413_v11, %v3895_v9  ;;  %v1157_v38 = vcombine.low %v1148_v20, %v1156_v4 }
 0x445   : > { %v1437_v13 = vcombine.low %v1428_v8, %v1436_v12  ;;  %v1133_v21 = vcombine.low %v1124_v17, %v1132_v19  ;;  %v1308_v5 = vshrl.u32 %v1280_v16, 16  ;;  %v1956_v47 = vcombine.high %v1955_v52, %v3580_v7 }
 0x446   : > { %v1307_v15 = vpack.i.b16 %v1304_v18, %v1280_v16  ;;  %v1309_v23 = vshrl.u32 %v1304_v18, 16  ;;  %v1448_v25 = vshrl.u32 %v1420_v14, 16  ;;  %v1164_v61 = vrot.slane %v1157_v38, %v3895_v9 }
 0x447   : > { %v1444_v44 = vrot.slane %v1437_v13, %v3895_v9  ;;  %v1140_v28 = vrot.slane %v1133_v21, %v3895_v9  ;;  %v1963_v0 = vrot.slane %v1955_v52, %v3895_v9  ;;  %v1970_v1 = vrot.slane %v1956_v47, %v3895_v9 }
 0x448   : > { %v1456_v6 = vsel %vm1451_vm5, %v1307_v15, 0  ;;  %v1310_v29 = vpack.i.b16 %v1309_v23, %v1308_v5  ;;  %v1169_v22 = vshrl.u32 %v1164_v61, 16 }
 0x449   : > { %3260 = vmatpush3.bf16.xpose.msra.mxu1 %v1456_v6  ;;  %v1449_v26 = vshrl.u32 %v1444_v44, 16  ;;  %v1167_v36 = vpack.i.b16 %v1164_v61, %v1140_v28  ;;  %v1168_v40 = vshrl.u32 %v1140_v28, 16  ;;  %v1447_v41 = vpack.i.b16 %v1444_v44, %v1420_v14 }
 0x44a   : > { %3265 = vmatprep.subr.bf16.mxu1 %v3572_v34  ;;  %v1502_v37 = vsel %vm1451_vm5, %v1310_v29, 0  ;;  %v1971_v16 = vcombine.high %v1963_v0, %v3580_v7  ;;  %v1972_v18 = vcombine.high %v1970_v1, %v3580_v7  ;;  %v2002_v44 = vshrl.u32 %v1963_v0, 16 }
 0x44b   : > { %v1450_v27 = vpack.i.b16 %v1449_v26, %v1448_v25  ;;  %v1170_v42 = vpack.i.b16 %v1169_v22, %v1168_v40  ;;  %v1569_v43 = vsel %vm1567_vm6, %v1447_v41, 0  ;;  %v2018_v6 = vshrl.u32 %v1970_v1, 16 }
 0x44c   : > { %v2010_v25 = vshrl.u32 %v1971_v16, 16  ;;  %v2026_v26 = vshrl.u32 %v1972_v18, 16 }
 0x44d   : > { %v1615_v30 = vsel %vm1567_vm6, %v1450_v27, 0 }
 0x44e   : > { %3278 = vmatpush3.bf16.msra.mxu0 %v1615_v30 }
 0x44f   : > { %3289 = vmatprep.subr.bf16.mxu0 %v3572_v34 }
 0x450   : > { %3262 = vmatmul.mubr.msk.bf16.vlgmr.msra.gmra.mrb[4].mxu1 %vm1451_vm5, %v1167_v36 }
 0x451   : > { %3266 = vmatpush3.bf16.xpose.msra.mxu1 %v1502_v37  ;;  %3267 = vmatprep.mubr.msk.bf16.mxu1 %vm3573_vm4, %v3572_v34 }
 0x452   : > { %3271 = vmatprep.subr.bf16.mxu1 %v3572_v34 }
 0x458   : > { %3268 = vmatmul.mubr.msk.bf16.vlgmr.msra.gmra.mrb[8].mxu1 %vm1451_vm5, %v1170_v42 }
 0x459   : > { %3272 = vmatpush3.bf16.msra.mxu1 %v1569_v43  ;;  %3273 = vmatprep.mubr.msk.bf16.mxu1 %vm3573_vm4, %v3572_v34 }
 0x45a   : > { %3283 = vmatprep.subr.bf16.mxu1 %v3572_v34 }
 0x523   : > { %v1492_v31 = vpop.f32.mrb[4].mxu1 }
 0x524   : > { %v3263_v45 = vpop.f32.mrb[5].mxu1  ;;  %v1544_v48 = vsel %vm1451_vm5, %v1492_v31, -inf }
 0x525   : > { %1545 = vmax.xlane.f32.xlu1 %v1544_v48  ;;  %v1495_v46 = vpop.f32.mrb[6].mxu1 }
 0x526   : > { %v3264_v49 = vpop.f32.mrb[7].mxu1 }
 0x52b   : > { %v1538_v33 = vpop.f32.mrb[8].mxu1 }
 0x52c   : > { %v3269_v50 = vpop.f32.mrb[9].mxu1  ;;  %v1547_v24 = vsel %vm1451_vm5, %v1538_v33, -inf }
 0x52d   : > { %1548 = vmax.xlane.f32.xlu0 %v1547_v24  ;;  %v1541_v51 = vpop.f32.mrb[10].mxu1 }
 0x52e   : > { %v3270_v54 = vpop.f32.mrb[11].mxu1 }
 0x536   : > { %1804 = vrot.lane.b32.xlu1 %v3877_v56, %s3581_s27 }
 0x53a   : > { %1806 = vrot.lane.b32.xlu1 %v3884_v58, %s3581_s27 }
 0x543   : > { %1946 = vrot.lane.b32.xlu0 %v3884_v58, %s3577_s5 }
 0x5b2   : > { %v1546_v55 = vpop.xlane.xlu1 %1545 }
 0x5b3   : > { %v1550_v39 = vsub.f32 %v1492_v31, %v1546_v55 }
 0x5b5   : > { %v1552_v63 = vmul.f32 1.442695, %v1550_v39 }
 0x5b6   : > { %v1805_v62 = vpop.permute.xlu1 %1804 }
 0x5b7   : > { %v1815_v57 = vrot.slane %v1805_v62, %v3888_v2  ;;  %3451 = vpow2.f32 %v1552_v63 }
 0x5b9   : > { %v1816_v35 = vcombine.high %v1815_v57, %v3580_v7  ;;  %v4040_v10 = vrot.slane %v1815_v57, %v3895_v9 }
 0x5ba   : > { %v1807_v59 = vpop.permute.xlu1 %1806  ;;  %v1549_v53 = vpop.xlane.xlu0 %1548 }
 0x5bb   : > { %v1840_v60 = vrot.slane %v1807_v59, %v3888_v2  ;;  %v1551_v32 = vsub.f32 %v1538_v33, %v1549_v53  ;;  %v4043_v11 = vrot.slane %v1816_v35, %v3895_v9  ;;  %v1831_v14 = vcombine.high %v4040_v10, %v3580_v7 }
 0x5bc   : > { %v1862_v61 = vshrl.u32 %v4040_v10, 16 }
 0x5bd   : > { %v1841_v3 = vcombine.high %v1840_v60, %v3580_v7  ;;  %v4047_v4 = vrot.slane %v1840_v60, %v3895_v9  ;;  %v1554_v8 = vmul.f32 1.442695, %v1551_v32  ;;  %v1832_v13 = vcombine.high %v4043_v11, %v3580_v7 }
 0x5be   : > { %v1947_v12 = vpop.permute.xlu0 %1946  ;;  %v1870_v27 = vshrl.u32 %v1831_v14, 16  ;;  %v1878_v36 = vshrl.u32 %v4043_v11, 16 }
 0x5bf   : > { %v4052_v19 = vrot.slane %v1841_v3, %v3895_v9  ;;  %v1980_v20 = vrot.slane %v1947_v12, %v3888_v2  ;;  %3453 = vpow2.f32 %v1554_v8  ;;  %v1856_v15 = vcombine.high %v4047_v4, %v3580_v7 }
 0x5c0   : > { %v1863_v21 = vshrl.u32 %v4047_v4, 16  ;;  %v1886_v37 = vshrl.u32 %v1832_v13, 16  ;;  %v1860_v32 = vpack.i.b16 %v4047_v4, %v4040_v10 }
 0x5c1   : > { %v1857_v17 = vcombine.high %v4052_v19, %v3580_v7  ;;  %v1981_v38 = vcombine.high %v1980_v20, %v3580_v7  ;;  %v1988_v23 = vrot.slane %v1980_v20, %v3895_v9  ;;  %v1879_v28 = vshrl.u32 %v4052_v19, 16  ;;  %v4074_v45 = vpop.eup %3451 }
 0x5c2   : > { %v1871_v22 = vshrl.u32 %v1856_v15, 16  ;;  %v1876_v40 = vpack.i.b16 %v4052_v19, %v4043_v11  ;;  %v1864_v41 = vpack.i.b16 %v1863_v21, %v1862_v61  ;;  %v1868_v42 = vpack.i.b16 %v1856_v15, %v1831_v14 }
 0x5c3   : > { %v1887_v5 = vshrl.u32 %v1857_v17, 16  ;;  %v1995_v29 = vrot.slane %v1981_v38, %v3895_v9  ;;  %v1996_v30 = vcombine.high %v1988_v23, %v3580_v7  ;;  %v2003_v31 = vshrl.u32 %v1988_v23, 16 }
 0x5c4   : > { %v2000_v46 = vpack.i.b16 %v1988_v23, %v1963_v0  ;;  %v1880_v50 = vpack.i.b16 %v1879_v28, %v1878_v36  ;;  %v1872_v55 = vpack.i.b16 %v1871_v22, %v1870_v27  ;;  %v1884_v52 = vpack.i.b16 %v1857_v17, %v1832_v13 }
 0x5c5   : > { %v1997_v43 = vcombine.high %v1995_v29, %v3580_v7  ;;  %v1888_v48 = vpack.i.b16 %v1887_v5, %v1886_v37  ;;  %v2011_v49 = vshrl.u32 %v1996_v30, 16  ;;  %v2016_v33 = vpack.i.b16 %v1995_v29, %v1970_v1 }
 0x5c6   : > { %v2008_v24 = vpack.i.b16 %v1996_v30, %v1971_v16  ;;  %v2019_v51 = vshrl.u32 %v1995_v29, 16  ;;  %v2004_v57 = vpack.i.b16 %v2003_v31, %v2002_v44  ;;  %v1562_v59 = vpack.c.bf16 %v4074_v45, %v4074_v45 }
 0x5c7   : > { %v2024_v54 = vpack.i.b16 %v1997_v43, %v1972_v18  ;;  %v2027_v39 = vshrl.u32 %v1997_v43, 16  ;;  %v2030_v62 = vcombine.low %v2000_v46, %v2016_v33  ;;  %v1922_v53 = vcombine.low %v1872_v55, %v1888_v48 }
 0x5c8   : > { %v2020_v63 = vpack.i.b16 %v2019_v51, %v2018_v6  ;;  %v2012_v0 = vpack.i.b16 %v2011_v49, %v2010_v25  ;;  %3274 = vmatmul.mubr.msk.bf16.vlgmr.msra.gmra.mrb[12].mxu1 %vm1451_vm5, %v1562_v59  ;;  %v1898_v12 = vcombine.low %v1868_v42, %v1884_v52  ;;  %v1914_v16 = vcombine.low %v1864_v41, %v1880_v50 }
 0x5c9   : > { %v4076_v47 = vpop.eup %3453  ;;  %v2038_v35 = vcombine.low %v2008_v24, %v2024_v54  ;;  %v2028_v60 = vpack.i.b16 %v2027_v39, %v2026_v26  ;;  %v2037_v11 = vrot.slane %v2030_v62, %v3888_v2  ;;  %3285 = vmatprep.mubr.msk.bf16.mxu1 %vm3573_vm4, %v3572_v34  ;;  %v1890_v10 = vcombine.low %v1860_v32, %v1876_v40 }
 0x5ca   : > { %v1563_v1 = vpack.c.bf16 %v4076_v47, %v4076_v47  ;;  %v2054_v3 = vcombine.low %v2004_v57, %v2020_v63  ;;  %v1929_v4 = vrot.slane %v1922_v53, %v3888_v2  ;;  %v1905_v13 = vrot.slane %v1898_v12, %v3888_v2 }
 0x5cb   : > { %v2045_v8 = vrot.slane %v2038_v35, %v3888_v2  ;;  %v2062_v18 = vcombine.low %v2012_v0, %v2028_v60  ;;  %v1921_v15 = vrot.slane %v1914_v16, %v3888_v2  ;;  %v1897_v44 = vrot.slane %v1890_v10, %v3888_v2 }
 0x5cc   : > { %3280 = vmatmul.mubr.msk.bf16.vlgmr.msra.gmra.mrb[0].mxu0 %vm1451_vm5, %v1563_v1  ;;  %v2061_v20 = vrot.slane %v2054_v3, %v3888_v2  ;;  %v1556_v35 = vsel %vm1451_vm5, %v4074_v45, 0.0  ;;  %v1559_v59 = vsel %vm1451_vm5, %v4076_v47, 0.0 }
 0x5cd   : > { %v2046_v19 = vcombine.low %v2037_v11, %v2045_v8  ;;  %3291 = vmatprep.mubr.msk.bf16.mxu0 %vm3573_vm4, %v3572_v34  ;;  %v2069_v14 = vrot.slane %v2062_v18, %v3888_v2  ;;  %v1930_v6 = vcombine.low %v1921_v15, %v1929_v4  ;;  %v1906_v23 = vcombine.low %v1897_v44, %v1905_v13 }
 0x5cf   : > { %v2053_v17 = vrot.slane %v2046_v19, %v3895_v9  ;;  %v2070_v38 = vcombine.low %v2061_v20, %v2069_v14  ;;  %v1937_v28 = vrot.slane %v1930_v6, %v3895_v9  ;;  %v1913_v30 = vrot.slane %v1906_v23, %v3895_v9 }
 0x5d1   : > { %v2077_v21 = vrot.slane %v2070_v38, %v3895_v9  ;;  %v2081_v26 = vshrl.u32 %v2053_v17, 16  ;;  %v1942_v36 = vshrl.u32 %v1937_v28, 16  ;;  %v1940_v37 = vpack.i.b16 %v1937_v28, %v1913_v30 }
 0x5d2   : > { %v1941_v22 = vshrl.u32 %v1913_v30, 16 }
 0x5d3   : > { %v2080_v25 = vpack.i.b16 %v2077_v21, %v2053_v17  ;;  %v2082_v61 = vshrl.u32 %v2077_v21, 16 }
 0x5d4   : > { %v1943_v40 = vpack.i.b16 %v1942_v36, %v1941_v22 }
 0x5d5   : > { %v2228_v5 = vsel %vm1451_vm5, %v2080_v25, 0  ;;  %v2083_v27 = vpack.i.b16 %v2082_v61, %v2081_v26 }
 0x5d6   : > { %3284 = vmatpush3.bf16.xpose.msra.mxu1 %v2228_v5 }
 0x5d7   : > { %v2274_v29 = vsel %vm1451_vm5, %v2083_v27, 0  ;;  %3295 = vmatprep.subr.bf16.mxu1 %v3572_v34 }
 0x5d8   : > { %3290 = vmatpush3.bf16.xpose.msra.mxu0 %v2274_v29 }
 0x5d9   : > { %3301 = vmatprep.subr.bf16.mxu0 %v3572_v34 }
 0x5dd   : > { %3286 = vmatmul.mubr.msk.bf16.vlgmr.msra.gmra.mrb[16].mxu1 %vm1451_vm5, %v1940_v37 }
 0x5de   : > { %3297 = vmatprep.mubr.msk.bf16.mxu1 %vm3573_vm4, %v3572_v34 }
 0x5df   : > { %3292 = vmatmul.mubr.msk.bf16.vlgmr.msra.gmra.mrb[4].mxu0 %vm1451_vm5, %v1943_v40 }
 0x5e0   : > { %3303 = vmatprep.mubr.msk.bf16.mxu0 %vm3573_vm4, %v3572_v34 }
 0x69b   : > { %v4112_v41 = vpop.f32.mrb[12].mxu1 }
 0x69c   : > { %v3275_v42 = vpop.f32.mrb[13].mxu1 }
 0x69d   : > { %v1608_v31 = vpop.f32.mrb[14].mxu1 }
 0x69e   : > { %v3276_v46 = vpop.f32.mrb[15].mxu1 }
 0x69f   : > { %v4114_v43 = vpop.f32.mrb[0].mxu0 }
 0x6a0   : > { %v3281_v48 = vpop.f32.mrb[1].mxu0 }
 0x6a1   : > { %v1654_v49 = vpop.f32.mrb[2].mxu0 }
 0x6a2   : > { %v3282_v33 = vpop.f32.mrb[3].mxu0 }
 0x6b0   : > { %v2264_v50 = vpop.f32.mrb[16].mxu1 }
 0x6b1   : > { %v3287_v24 = vpop.f32.mrb[17].mxu1  ;;  %v2316_v51 = vsel %vm1451_vm5, %v2264_v50, -inf }
 0x6b2   : > { %v2310_v54 = vpop.f32.mrb[4].mxu0  ;;  %2317 = vmax.xlane.f32.xlu1 %v2316_v51  ;;  %v2267_v55 = vpop.f32.mrb[18].mxu1 }
 0x6b3   : > { %v3288_v52 = vpop.f32.mrb[19].mxu1  ;;  %v3293_v39 = vpop.f32.mrb[5].mxu0  ;;  %v2319_v62 = vsel %vm1451_vm5, %v2310_v54, -inf }
 0x6b4   : > { %2320 = vmax.xlane.f32.xlu0 %v2319_v62  ;;  %v2313_v57 = vpop.f32.mrb[6].mxu0 }
 0x6b5   : > { %v3294_v63 = vpop.f32.mrb[7].mxu0 }
 0x6c3   : > { %2084 = vrot.lane.b32.xlu1 %v3877_v56, %s3582_s10 }
 0x6ca   : > { %2086 = vrot.lane.b32.xlu0 %v3884_v58, %s3582_s10  ;;  %s4408_s10 = sld [smem:[#allocation29_spill]] (!%p3197_p1) }
 0x6e7   : > { %1557 = vadd.xlane.f32.xlu1 %v1556_v35 }
 0x6e9   : > { %1560 = vadd.xlane.f32.xlu0 %v1559_v59 }
 0x73f   : > { %v2318_v53 = vpop.xlane.xlu1 %2317 }
 0x740   : > { %v2322_v0 = vsub.f32 %v2264_v50, %v2318_v53 }
 0x741   : > { %v2321_v60 = vpop.xlane.xlu0 %2320 }
 0x742   : > { %v2324_v1 = vmul.f32 1.442695, %v2322_v0  ;;  %v2323_v32 = vsub.f32 %v2310_v54, %v2321_v60  ;;  %v3437_v60 = vld [vmem:[%s3794_s21] sm:$0xff]  }
 0x743   : > { %v2085_v11 = vpop.permute.xlu1 %2084 }
 0x744   : > { %3455 = vpow2.f32 %v2324_v1  ;;  %v2326_v3 = vmul.f32 1.442695, %v2323_v32  ;;  %v2095_v56 = vrot.slane %v2085_v11, %v3888_v2 }
 0x745   : > { %v2087_v8 = vpop.permute.xlu0 %2086 }
 0x746   : > { %3457 = vpow2.f32 %v2326_v3  ;;  %v2096_v58 = vcombine.high %v2095_v56, %v3580_v7  ;;  %v2103_v45 = vrot.slane %v2095_v56, %v3895_v9  ;;  %v2120_v12 = vrot.slane %v2087_v8, %v3888_v2 }
 0x748   : > { %v2110_v47 = vrot.slane %v2096_v58, %v3895_v9  ;;  %v2111_v16 = vcombine.high %v2103_v45, %v3580_v7  ;;  %v2121_v18 = vcombine.high %v2120_v12, %v3580_v7  ;;  %v2128_v19 = vrot.slane %v2120_v12, %v3895_v9 }
 0x749   : > { %v2142_v4 = vshrl.u32 %v2103_v45, 16 }
 0x74a   : > { %v2112_v10 = vcombine.high %v2110_v47, %v3580_v7  ;;  %v2135_v20 = vrot.slane %v2121_v18, %v3895_v9  ;;  %v2150_v14 = vshrl.u32 %v2111_v16, 16  ;;  %v2158_v13 = vshrl.u32 %v2110_v47, 16 }
 0x74b   : > { %v2136_v15 = vcombine.high %v2128_v19, %v3580_v7  ;;  %v2143_v17 = vshrl.u32 %v2128_v19, 16  ;;  %v2140_v44 = vpack.i.b16 %v2128_v19, %v2103_v45 }
 0x74c   : > { %v2137_v38 = vcombine.high %v2135_v20, %v3580_v7  ;;  %v2156_v6 = vpack.i.b16 %v2135_v20, %v2110_v47  ;;  %v2159_v21 = vshrl.u32 %v2135_v20, 16  ;;  %v2166_v23 = vshrl.u32 %v2112_v10, 16 }
 0x74d   : > { %v2144_v25 = vpack.i.b16 %v2143_v17, %v2142_v4  ;;  %v2148_v26 = vpack.i.b16 %v2136_v15, %v2111_v16  ;;  %v2151_v61 = vshrl.u32 %v2136_v15, 16 }
 0x74e   : > { %v3456_v5 = vpop.eup %3455  ;;  %v2160_v27 = vpack.i.b16 %v2159_v21, %v2158_v13  ;;  %v2164_v28 = vpack.i.b16 %v2137_v38, %v2112_v10  ;;  %v2167_v29 = vshrl.u32 %v2137_v38, 16  ;;  %v2170_v30 = vcombine.low %v2140_v44, %v2156_v6 }
 0x74f   : > { %v2328_v36 = vsel %vm1451_vm5, %v3456_v5, 0.0  ;;  %v2152_v22 = vpack.i.b16 %v2151_v61, %v2150_v14  ;;  %v2334_v53 = vpack.c.bf16 %v3456_v5, %v3456_v5 }
 0x750   : > { %v3458_v37 = vpop.eup %3457  ;;  %v2168_v40 = vpack.i.b16 %v2167_v29, %v2166_v23  ;;  %v2178_v42 = vcombine.low %v2148_v26, %v2164_v28  ;;  %v2194_v31 = vcombine.low %v2144_v25, %v2160_v27  ;;  %2329 = vadd.xlane.f32.xlu1 %v2328_v36  ;;  %v2177_v46 = vrot.slane %v2170_v30, %v3888_v2 }
 0x751   : > { %v2331_v48 = vsel %vm1451_vm5, %v3458_v37, 0.0  ;;  %v2335_v0 = vpack.c.bf16 %v3458_v37, %v3458_v37 }
 0x752   : > { %v2202_v49 = vcombine.low %v2152_v22, %v2168_v40  ;;  %2332 = vadd.xlane.f32.xlu0 %v2331_v48  ;;  %v2185_v33 = vrot.slane %v2178_v42, %v3888_v2  ;;  %v2201_v24 = vrot.slane %v2194_v31, %v3888_v2 }
 0x754   : > { %v2186_v50 = vcombine.low %v2177_v46, %v2185_v33  ;;  %v2209_v51 = vrot.slane %v2202_v49, %v3888_v2 }
 0x756   : > { %v2193_v54 = vrot.slane %v2186_v50, %v3895_v9  ;;  %v2210_v55 = vcombine.low %v2201_v24, %v2209_v51 }
 0x758   : > { %v2217_v52 = vrot.slane %v2210_v55, %v3895_v9  ;;  %v2221_v62 = vshrl.u32 %v2193_v54, 16 }
 0x75a   : > { %v2220_v39 = vpack.i.b16 %v2217_v52, %v2193_v54  ;;  %v2222_v57 = vshrl.u32 %v2217_v52, 16 }
 0x75c   : > { %v2340_v63 = vsel %vm1567_vm6, %v2220_v39, 0  ;;  %v2223_v35 = vpack.i.b16 %v2222_v57, %v2221_v62  ;;  %v3438_v62 = vld [vmem:[%s3794_s21 + $0x8] sm:$0xff]  }
 0x75d   : > { %3296 = vmatpush3.bf16.msra.mxu1 %v2340_v63 }
 0x75e   : > { %v2386_v59 = vsel %vm1567_vm6, %v2223_v35, 0  ;;  %3307 = vmatprep.subr.bf16.mxu1 %v3572_v34 }
 0x75f   : > { %3302 = vmatpush3.bf16.msra.mxu0 %v2386_v59 }
 0x760   : > { %3298 = vmatmul.mubr.msk.bf16.vlgmr.msra.gmra.mrb[20].mxu1 %vm1451_vm5, %v2334_v53  ;;  %3313 = vmatprep.subr.bf16.mxu0 %v3572_v34 }
 0x761   : > { %3309 = vmatprep.mubr.msk.bf16.mxu1 %vm3573_vm4, %v3572_v34  ;;  %3308 = vmatpush3.bf16.msra.mxu1 %v3438_v62 }
 0x762   : > { %3304 = vmatmul.mubr.msk.bf16.vlgmr.msra.gmra.mrb[8].mxu0 %vm1451_vm5, %v2335_v0  ;;  %3319 = vmatprep.subr.bf16.mxu1 %v3572_v34 }
 0x763   : > { %3314 = vmatpush3.bf16.msra.mxu0 %v3437_v60  ;;  %3315 = vmatprep.mubr.msk.bf16.mxu0 %vm3573_vm4, %v3572_v34 }
 0x764   : > { %3327 = vmatprep.subr.bf16.mxu0 %v3572_v34 }
 0x774   : > { %v1558_v1 = vpop.xlane.xlu1 %1557 }
 0x775   : > { %3459 = vrcp.f32 %v1558_v1 }
 0x776   : > { %v1561_v32 = vpop.xlane.xlu0 %1560 }
 0x777   : > { %3461 = vrcp.f32 %v1561_v32 }
 0x77f   : > { %v3460_v11 = vpop.eup %3459 }
 0x780   : > { %v1659_v3 = vmul.f32 %v3460_v11, %v4112_v41 }
 0x781   : > { %v3462_v56 = vpop.eup %3461 }
 0x782   : > { %v1661_v8 = vpack.c.bf16 %v1659_v3, %v1659_v3  ;;  %v1660_v58 = vmul.f32 %v3462_v56, %v4114_v43 }
 0x784   : > { %v1668_v45 = vrot.slane %v1661_v8, %v3888_v2  ;;  %v1686_v12 = vpack.c.bf16 %v1660_v58, %v1660_v58 }
 0x786   : > { %v1669_v47 = vcombine.high %v1668_v45, %v3580_v7  ;;  %v1676_v16 = vrot.slane %v1668_v45, %v3895_v9  ;;  %v1693_v18 = vrot.slane %v1686_v12, %v3888_v2 }
 0x788   : > { %v1683_v19 = vrot.slane %v1669_v47, %v3895_v9  ;;  %v1694_v10 = vcombine.high %v1693_v18, %v3580_v7  ;;  %v1701_v4 = vrot.slane %v1693_v18, %v3895_v9  ;;  %v1684_v41 = vcombine.high %v1676_v16, %v3580_v7 }
 0x789   : > { %v1715_v15 = vshrl.u32 %v1676_v16, 16 }
 0x78a   : > { %v1708_v20 = vrot.slane %v1694_v10, %v3895_v9  ;;  %v1685_v43 = vcombine.high %v1683_v19, %v3580_v7  ;;  %v1709_v14 = vcombine.high %v1701_v4, %v3580_v7  ;;  %v1713_v13 = vpack.i.b16 %v1701_v4, %v1676_v16 }
 0x78b   : > { %v1716_v17 = vshrl.u32 %v1701_v4, 16  ;;  %v1723_v38 = vshrl.u32 %v1684_v41, 16  ;;  %v1731_v26 = vshrl.u32 %v1683_v19, 16 }
 0x78c   : > { %v1710_v44 = vcombine.high %v1708_v20, %v3580_v7  ;;  %v1721_v6 = vpack.i.b16 %v1709_v14, %v1684_v41  ;;  %v1724_v21 = vshrl.u32 %v1709_v14, 16  ;;  %v1729_v23 = vpack.i.b16 %v1708_v20, %v1683_v19 }
 0x78d   : > { %v1717_v25 = vpack.i.b16 %v1716_v17, %v1715_v15  ;;  %v1732_v61 = vshrl.u32 %v1708_v20, 16  ;;  %v1739_v5 = vshrl.u32 %v1685_v43, 16 }
 0x78e   : > { %v1725_v27 = vpack.i.b16 %v1724_v21, %v1723_v38  ;;  %v1737_v28 = vpack.i.b16 %v1710_v44, %v1685_v43  ;;  %v1740_v29 = vshrl.u32 %v1710_v44, 16  ;;  %v1743_v30 = vcombine.low %v1713_v13, %v1729_v23 }
 0x78f   : > { %v1733_v36 = vpack.i.b16 %v1732_v61, %v1731_v26 }
 0x790   : > { %v1741_v37 = vpack.i.b16 %v1740_v29, %v1739_v5  ;;  %v1751_v22 = vcombine.low %v1721_v6, %v1737_v28  ;;  %v1750_v42 = vrot.slane %v1743_v30, %v3888_v2 }
 0x791   : > { %v1767_v40 = vcombine.low %v1717_v25, %v1733_v36 }
 0x792   : > { %v1758_v31 = vrot.slane %v1751_v22, %v3888_v2  ;;  %v1775_v48 = vcombine.low %v1725_v27, %v1741_v37 }
 0x793   : > { %v1774_v49 = vrot.slane %v1767_v40, %v3888_v2 }
 0x794   : > { %v1759_v46 = vcombine.low %v1750_v42, %v1758_v31  ;;  %v1782_v33 = vrot.slane %v1775_v48, %v3888_v2 }
 0x796   : > { %v1766_v50 = vrot.slane %v1759_v46, %v3895_v9  ;;  %v1783_v24 = vcombine.low %v1774_v49, %v1782_v33 }
 0x798   : > { %v1790_v51 = vrot.slane %v1783_v24, %v3895_v9  ;;  %v1794_v54 = vshrl.u32 %v1766_v50, 16 }
 0x79a   : > { %v1795_v55 = vshrl.u32 %v1790_v51, 16  ;;  %v1793_v52 = vpack.i.b16 %v1790_v51, %v1766_v50 }
 0x79c   : > { %v1796_v39 = vpack.i.b16 %v1795_v55, %v1794_v54 }
 0x79e   : > { %1797 = vrot.lane.b32.xlu1 %v1796_v39, %s3583_s3 }
 0x7dd   : > { %v2330_v57 = vpop.xlane.xlu1 %2329 }
 0x7de   : > { %3463 = vrcp.f32 %v2330_v57 }
 0x7df   : > { %v2333_v59 = vpop.xlane.xlu0 %2332 }
 0x7e0   : > { %3465 = vrcp.f32 %v2333_v59 }
 0x7e8   : > { %v3464_v53 = vpop.eup %3463 }
 0x7ea   : > { %v3466_v32 = vpop.eup %3465 }
 0x810   : > { %v1798_v63 = vpop.permute.xlu1 %1797 }
 0x811   : > { %v1801_v35 = vsel %vm1451_vm5, %v1793_v52, %v1798_v63 }
 0x812   : > { %3316 = vmatmul.mubr.msk.bf16.vlgmr.msra.gmra.mrb[12].mxu0 %vm2581_vm7, %v1801_v35 }
 0x813   : > { %3343 = vmatprep.mubr.msk.bf16.mxu0 %vm3573_vm4, %v3572_v34 }
 0x833   : > { %v2376_v0 = vpop.f32.mrb[20].mxu1 }
 0x834   : > { %v2430_v60 = vmul.f32 %v3464_v53, %v2376_v0  ;;  %v3299_v1 = vpop.f32.mrb[21].mxu1 }
 0x835   : > { %v2379_v11 = vpop.f32.mrb[22].mxu1  ;;  %v2422_v3 = vpop.f32.mrb[8].mxu0 }
 0x836   : > { %v2432_v56 = vpack.c.bf16 %v2430_v60, %v2430_v60  ;;  %v2431_v8 = vmul.f32 %v3466_v32, %v2422_v3  ;;  %v3300_v58 = vpop.f32.mrb[23].mxu1  ;;  %v3305_v45 = vpop.f32.mrb[9].mxu0  ;;  %v3181_v32 = vld [vmem:[%s4404_s23] ss:$0 sm:$0xff] }
 0x837   : > { %v2425_v12 = vpop.f32.mrb[10].mxu0  ;;  %v3471_v3 = vld [vmem:[#allocation2] sm:$0xff] }
 0x838   : > { %v2439_v47 = vrot.slane %v2432_v56, %v3888_v2  ;;  %v2457_v16 = vpack.c.bf16 %v2431_v8, %v2431_v8  ;;  %v3306_v18 = vpop.f32.mrb[11].mxu0 }
 0x839   : > { %v3440_v18 = vld [vmem:[%s3811_s0 + $0x8] sm:$0xff]  }
 0x83a   : > { %v2440_v19 = vcombine.high %v2439_v47, %v3580_v7  ;;  %v2447_v10 = vrot.slane %v2439_v47, %v3895_v9  ;;  %v2464_v4 = vrot.slane %v2457_v16, %v3888_v2  ;;  %v3439_v16 = vld [vmem:[%s3811_s0] sm:$0xff]   ;;  %s4405_s0 = scalar_lea.vmem %s4339_s12, %s3768_s1 }
 0x83c   : > { %v2454_v41 = vrot.slane %v2440_v19, %v3895_v9  ;;  %v2455_v20 = vcombine.high %v2447_v10, %v3580_v7  ;;  %v2465_v43 = vcombine.high %v2464_v4, %v3580_v7  ;;  %v2472_v14 = vrot.slane %v2464_v4, %v3895_v9 }
 0x83d   : > { %v2486_v15 = vshrl.u32 %v2447_v10, 16 }
 0x83e   : > { %v2456_v13 = vcombine.high %v2454_v41, %v3580_v7  ;;  %v2479_v17 = vrot.slane %v2465_v43, %v3895_v9  ;;  %v2494_v38 = vshrl.u32 %v2455_v20, 16  ;;  %v2480_v44 = vcombine.high %v2472_v14, %v3580_v7 }
 0x83f   : > { %v2484_v6 = vpack.i.b16 %v2472_v14, %v2447_v10  ;;  %v2487_v21 = vshrl.u32 %v2472_v14, 16  ;;  %v2502_v23 = vshrl.u32 %v2454_v41, 16 }
 0x840   : > { %v2481_v25 = vcombine.high %v2479_v17, %v3580_v7  ;;  %v2500_v26 = vpack.i.b16 %v2479_v17, %v2454_v41  ;;  %v2503_v61 = vshrl.u32 %v2479_v17, 16  ;;  %v2510_v5 = vshrl.u32 %v2456_v13, 16  ;;  %v3182_v17 = vld [vmem:[%s4405_s0] ss:$0 sm:$0xff] }
 0x841   : > { %v2488_v27 = vpack.i.b16 %v2487_v21, %v2486_v15  ;;  %v2492_v28 = vpack.i.b16 %v2480_v44, %v2455_v20  ;;  %v2495_v29 = vshrl.u32 %v2480_v44, 16  ;;  %v3183_v44 = vld [vmem:[%s812_s8] ss:$0 sm:$0xff] }
 0x842   : > { %v2504_v30 = vpack.i.b16 %v2503_v61, %v2502_v23  ;;  %v2508_v36 = vpack.i.b16 %v2481_v25, %v2456_v13  ;;  %v2511_v37 = vshrl.u32 %v2481_v25, 16  ;;  %v2514_v22 = vcombine.low %v2484_v6, %v2500_v26  ;;  %v3441_v25 = vld [vmem:[%s3825_s26] sm:$0xff]   ;;  %v3442_v26 = vld [vmem:[%s3825_s26 + $0x8] sm:$0xff]   ;;  %v3443_v61 = vld [vmem:[%s3825_s26 + $0x10] sm:$0xff]  }
 0x843   : > { %v2496_v40 = vpack.i.b16 %v2495_v29, %v2494_v38  ;;  %3328 = vmatpush3.bf16.msra.mxu0 %v3441_v25  ;;  %v3447_v29 = vld [vmem:[%s3825_s26 + $0x30] sm:$0xff]  }
 0x844   : > { %v2512_v42 = vpack.i.b16 %v2511_v37, %v2510_v5  ;;  %v2522_v31 = vcombine.low %v2492_v28, %v2508_v36  ;;  %v2538_v48 = vcombine.low %v2488_v27, %v2504_v30  ;;  %v2521_v46 = vrot.slane %v2514_v22, %v3888_v2  ;;  %3329 = vmatprep.subr.bf16.mxu0 %v3572_v34  ;;  %v3444_v5 = vld [vmem:[%s3825_s26 + $0x18] sm:$0xff]   ;;  %v3445_v27 = vld [vmem:[%s3825_s26 + $0x20] sm:$0xff]   ;;  %v3446_v28 = vld [vmem:[%s3825_s26 + $0x28] sm:$0xff]  }
 0x845   : > { %v3448_v30 = vld [vmem:[%s3825_s26 + $0x38] sm:$0xff]   ;;  %v3184_v36 = vld [vmem:[%s820_s29] ss:$0 sm:$0xff] }
 0x846   : > { %v2529_v49 = vrot.slane %v2522_v31, %v3888_v2  ;;  %v2546_v33 = vcombine.low %v2496_v40, %v2512_v42  ;;  %v2545_v50 = vrot.slane %v2538_v48, %v3888_v2 }
 0x847   : > { %3330 = vmatpush3.bf16.msra.mxu0 %v3442_v26 }
 0x848   : > { %v2530_v7 = vcombine.low %v2521_v46, %v2529_v49  ;;  %v2553_v24 = vrot.slane %v2546_v33, %v3888_v2  ;;  %3331 = vmatprep.subr.bf16.mxu0 %v3572_v34 }
 0x84a   : > { %v2537_v51 = vrot.slane %v2530_v7, %v3895_v9  ;;  %v2554_v54 = vcombine.low %v2545_v50, %v2553_v24 }
 0x84b   : > { %3332 = vmatpush3.bf16.msra.mxu0 %v3443_v61 }
 0x84c   : > { %v2561_v55 = vrot.slane %v2554_v54, %v3895_v9  ;;  %v2565_v52 = vshrl.u32 %v2537_v51, 16  ;;  %3333 = vmatprep.subr.bf16.mxu0 %v3572_v34 }
 0x84e   : > { %v2566_v39 = vshrl.u32 %v2561_v55, 16  ;;  %v2564_v62 = vpack.i.b16 %v2561_v55, %v2537_v51  ;;  %v3188_v55 = vld [vmem:[%s828_s20] ss:$0 sm:$0xff] }
 0x84f   : > { %3334 = vmatpush3.bf16.msra.mxu0 %v3444_v5 }
 0x850   : > { %v2567_v57 = vpack.i.b16 %v2566_v39, %v2565_v52  ;;  %3335 = vmatprep.subr.bf16.mxu0 %v3572_v34 }
 0x852   : > { %2568 = vrot.lane.b32.xlu0 %v2567_v57, %s3583_s3 }
 0x853   : > { %3336 = vmatpush3.bf16.msra.mxu0 %v3445_v27 }
 0x854   : > { %3337 = vmatprep.subr.bf16.mxu0 %v3572_v34 }
 0x857   : > { %3338 = vmatpush3.bf16.msra.mxu0 %v3446_v28 }
 0x858   : > { %3339 = vmatprep.subr.bf16.mxu0 %v3572_v34 }
 0x85b   : > { %3340 = vmatpush3.bf16.msra.mxu0 %v3447_v29 }
 0x85c   : > { %3341 = vmatprep.subr.bf16.mxu0 %v3572_v34 }
 0x85f   : > { %3342 = vmatpush3.bf16.msra.mxu0 %v3448_v30 }
 0x8c4   : > { %v2569_v63 = vpop.permute.xlu0 %2568 }
 0x8c5   : > { %v2572_v35 = vsel %vm1451_vm5, %v2564_v62, %v2569_v63 }
 0x8c6   : > { %3310 = vmatmul.mubr.msk.bf16.vlgmr.msra.gmra.mrb[24].mxu1 %vm2581_vm7, %v2572_v35 }
 0x8c7   : > { %3323 = vmatprep.mubr.msk.bf16.mxu1 %vm3573_vm4, %v3572_v34  ;;  %3320 = vmatpush3.bf16.msra.mxu1 %v3439_v16 }
 0x8c8   : > { %3321 = vmatprep.subr.bf16.mxu1 %v3572_v34 }
 0x8cb   : > { %3322 = vmatpush3.bf16.msra.mxu1 %v3440_v18 }
 0x8e5   : > { %v2666_v2 = vpop.f32.mrb[12].mxu0 }
 0x8e6   : > { %v3317_v59 = vpop.f32.mrb[13].mxu0 }
 0x8e7   : > { %v2669_v53 = vpop.f32.mrb[14].mxu0 }
 0x8e8   : > { %v3318_v9 = vpop.f32.mrb[15].mxu0 }
 0x999   : > { %v2618_v0 = vpop.f32.mrb[24].mxu1 }
 0x99a   : > { %v2667_v60 = vadd.f32 %v2666_v2, %v2618_v0  ;;  %v3311_v1 = vpop.f32.mrb[25].mxu1 }
 0x99b   : > { %v2621_v11 = vpop.f32.mrb[26].mxu1 }
 0x99c   : > { %v2672_v56 = vadd.f32 %v3471_v3, %v2667_v60  ;;  %v3312_v8 = vpop.f32.mrb[27].mxu1 }
 0x99e   : > { %v4211_v58 = vadd.f32 %v3181_v32, %v2672_v56 }
 0x9a0   : > { %v2683_v45 = vsel %vm934_vm3, %v4211_v58, 0.0  ;;  %v2687_v12 = vmul.f32 %v4211_v58, %v4211_v58 }
 0x9a1   : > { %2684 = vadd.xlane.f32.xlu1 %v2683_v45 }
 0x9a2   : > { %v2688_v47 = vsel %vm934_vm3, %v2687_v12, 0.0  ;;  %v3199_v12 = vld [vmem:[%s4408_s10] ss:$0 sm:$0xff] (!%p3197_p1) }
 0x9a3   : > { %2689 = vadd.xlane.f32.xlu0 %v2688_v47 }
 0xa2e   : > { %v2685_v19 = vpop.xlane.xlu1 %2684 }
 0xa2f   : > { %v2686_v10 = vmul.f32 0.03125, %v2685_v19 }
 0xa30   : > { %v2690_v4 = vpop.xlane.xlu0 %2689 }
 0xa31   : > { %v2692_v41 = vmul.f32 %v2686_v10, %v2686_v10  ;;  %v2691_v20 = vmul.f32 0.03125, %v2690_v4  ;;  %v2694_v13 = vsub.f32 %v4211_v58, %v2686_v10 }
 0xa33   : > { %v2693_v43 = vsub.f32 %v2691_v20, %v2692_v41 }
 0xa35   : > { %v2695_v14 = vadd.f32 1e-05, %v2693_v43 }
 0xa37   : > { %3467 = vrsqrt.f32 %v2695_v14 }
 0xa41   : > { %v3468_v15 = vpop.eup %3467 }
 0xa42   : > { %v2697_v38 = vmul.f32 %v3468_v15, %v2694_v13 }
 0xa44   : > { %v2704_v6 = vmul.f32 %v3182_v17, %v2697_v38 }
 0xa46   : > { %v2711_v21 = vadd.f32 %v3183_v44, %v2704_v6 }
 0xa48   : > { %v2712_v23 = vpack.c.bf16 %v2711_v21, %v2711_v21 }
 0xa4a   : > { %3324 = vmatmul.mubr.msk.bf16.vlgmr.msra.gmra.mrb[28].mxu1 %vm934_vm3, %v2712_v23 }
 0xb1d   : > { %v2773_v37 = vpop.f32.mrb[28].mxu1 }
 0xb1e   : > { %v2774_v22 = vadd.f32 %v3184_v36, %v2773_v37  ;;  %v3325_v40 = vpop.f32.mrb[29].mxu1 }
 0xb1f   : > { %v2776_v42 = vpop.f32.mrb[30].mxu1 }
 0xb20   : > { %v2779_v31 = vmul.f32 %v2774_v22, %v2774_v22  ;;  %v3326_v48 = vpop.f32.mrb[31].mxu1 }
 0xb22   : > { %v2780_v46 = vmul.f32 %v2779_v31, %v2774_v22 }
 0xb24   : > { %v2781_v49 = vmul.f32 0.044715, %v2780_v46 }
 0xb26   : > { %v2782_v33 = vadd.f32 %v2781_v49, %v2774_v22 }
 0xb28   : > { %v2783_v7 = vmul.f32 0.7978846, %v2782_v33 }
 0xb2a   : > { %3469 = vtanh.f32 %v2783_v7 }
 0xb34   : > { %v3470_v50 = vpop.eup %3469 }
 0xb35   : > { %v2785_v34 = vadd.f32 1.0, %v3470_v50 }
 0xb37   : > { %v2786_v24 = vmul.f32 0.5, %v2785_v34 }
 0xb39   : > { %v2787_v51 = vmul.f32 %v2786_v24, %v2774_v22 }
 0xb3b   : > { %v2788_v54 = vpack.c.bf16 %v2787_v51, %v2787_v51 }
 0xb3d   : > { %3344 = vmatmul.mubr.bf16.vlgmr.msra.gmra.mrb[16].mxu0 %v2788_v54 }
 0xc0f   : > { %2905 = sbr.rel (%p3197_p1) target bundleno = 3264 (0xcc0), region = 108 }
 0xc10   : > { %v2894_v52 = vpop.f32.mrb[16].mxu0 }
 0xc11   : > { %v2895_v39 = vadd.f32 %v3188_v55, %v2894_v52  ;;  %v3345_v62 = vpop.f32.mrb[17].mxu0 }
 0xc12   : > { %v2897_v57 = vpop.f32.mrb[18].mxu0 }
 0xc13   : > { %v2900_v63 = vadd.f32 %v2895_v39, %v4211_v58  ;;  %v3346_v35 = vpop.f32.mrb[19].mxu0  ;;  %v3198_v58 = vld [vmem:[%s4407_s24] ss:$0 sm:$0xff] (!%p3197_p1) }
 0xc15   : > { %2901 = vst.msk [vmem:[#allocation2] sm:$0xff] %vm934_vm3, %v2900_v63  ;;  %v2908_v2 = vsel (!%p3197_p1), %vm934_vm3, %v2900_v63, 0.0  ;;  %v2912_v59 = vmul.f32 (!%p3197_p1), %v2900_v63, %v2900_v63 }
 0xc16   : > { %2909 = vadd.xlane.f32.xlu0 %v2908_v2 }
 0xc17   : > { %v2913_v53 = vsel %vm934_vm3, %v2912_v59, 0.0 }
 0xc1a   : > { %2914 = vadd.xlane.f32.xlu0 %v2913_v53 }
 0xca3   : > { %v2910_v9 = vpop.xlane.xlu0 %2909 }
 0xca4   : > { %v2911_v0 = vmul.f32 0.03125, %v2910_v9 }
 0xca6   : > { %v2917_v1 = vmul.f32 %v2911_v0, %v2911_v0  ;;  %v2919_v56 = vsub.f32 %v2900_v63, %v2911_v0 }
 0xca7   : > { %v2915_v60 = vpop.xlane.xlu0 %2914 }
 0xca8   : > { %v2916_v32 = vmul.f32 0.03125, %v2915_v60 }
 0xcaa   : > { %v2918_v11 = vsub.f32 %v2916_v32, %v2917_v1 }
 0xcac   : > { %v2920_v3 = vadd.f32 1e-05, %v2918_v11 }
 0xcae   : > { %3472 = vrsqrt.f32 %v2920_v3 }
 0xcb8   : > { %v3473_v8 = vpop.eup %3472 }
 0xcb9   : > { %v2922_v45 = vmul.f32 %v3473_v8, %v2919_v56 }
 0xcbb   : > { %v2929_v47 = vmul.f32 %v3198_v58, %v2922_v45 }
 0xcbd   : > { %v2936_v16 = vadd.f32 %v3199_v12, %v2929_v47 }
 0xcbf   : > { %2937 = vst.msk [vmem:[%s780_s18] sm:$0xff] %vm934_vm3, %v2936_v16 }
 0xcc0 PF: > { %s4409_s3 = sld [smem:[#allocation10_spill]]  ;;  %s4410_s21 = sld [smem:[#allocation7_spill]] }
 0xcc1   : > { %s4412_s0 = sld [smem:[#allocation30_spill]]  ;;  %s2952_s19 = sshll.u32 %s780_s18, 4  ;;  %s2953_s19 = int_to_ptr.vmem [resolvable:$true] %s2952_s19 }
 0xcc2   : > { %s3474_s26 = scalar_lea.vmem %s2953_s19, 128  ;;  %s3584_s29 = smov [#allocation3]  }
 0xcc3   : > { %p3475_p2 = scmp.ne.s32.totalorder %s2953_s19, %s3474_s26  ;;  %s3478_s2 = sshll.u32 %s3584_s29, 4  ;;  %s3479_s2 = int_to_ptr.vmem [resolvable:$false] %s3478_s2 }
 0xcc4   : > { %s3480_s1 = scalar_lea.vmem %s3479_s2, 256  ;;  %p3481_p6 = scmp.lt.s32.totalorder %s2953_s19, %s3479_s2 }
 0xcc5   : > { %p3476_p4 = pnand %p3475_p2, %p3739_p3  ;;  %p3482_p7 = scmp.lt.s32.totalorder %s3480_s1, %s3474_s26 }
 0xcc6   : > { %s3201_s23 = sshll.u32 %s4409_s3, 7  ;;  %s4413_s8 = sand.u32 1, %s4410_s21  }
 0xcc7   : > { %s4276_s30 = scalar_lea.hbm %s4412_s0, %s3201_s23  ;;  %s2939_s7 = scalar_lea.sflag [#allocation4], %s4413_s8 }
 0xcc8   : > { %p3477_p5 = pneg %p3476_p4  ;;  %p3483_p8 = por %p3482_p7, %p3481_p6 }
 0xcca   : > { %p3484_p10 = pnand %p3483_p8, %p3477_p5 }
 0xccc   : > { %3487 = shalt.err (!%p3484_p10)
}
 0xccd   : > { %s3488_s25 = scalar_lea.hbm %s4276_s30, 128  ;;  %s3492_s24 = scalar_lea.hbm %s4412_s0, 256 }
 0xcce   : > { %p3489_p11 = scmp.ne.s32.totalorder %s4276_s30, %s3488_s25  ;;  %p3493_p0 = scmp.lt.u32.totalorder %s4276_s30, %s4412_s0 }
 0xccf   : > { %p3494_p1 = scmp.lt.u32.totalorder %s3492_s24, %s3488_s25  ;;  %p3496_p4 = scmp.lt.u32.totalorder %s3488_s25, %s4276_s30 }
 0xcd0   : > { %p3490_p12 = pnand %p3489_p11, %p3739_p3 }
 0xcd1   : > { %p3495_p2 = por %p3494_p1, %p3493_p0 }
 0xcd2   : > { %p3491_p13 = pneg %p3490_p12 }
 0xcd3   : > { %p3497_p5 = por %p3496_p4, %p3495_p2 }
 0xcd5   : > { %p3498_p6 = pnand %p3497_p5, %p3491_p13 }
 0xcd7   : > { %3501 = shalt.err (!%p3498_p6)
}
 0xcd8   : > { %3347 = dma.vmem_to_hbm [thread:$0]  (%p3739_p3), %s2953_s19, 128, %s4276_s30, %s2939_s7  }
 0xcd9 PF: > { %s4414_s10 = sld [smem:[#allocation13_spill]]  ;;  %s4415_s3 = sld [smem:[#allocation6_spill]] }
 0xcdf   : > { %p3353_p7 = scmp.ge.s32.totalorder %s4414_s10, 2  ;;  %s2964_s23 = sand.u32 1, %s4415_s3  }
 0xce0   : > { %s2965_s4 = scalar_lea.sflag [#allocation4], %s2964_s23 }
 0xce1   : > { %p3350_p8 = pnand %p3353_p7, %p3749_p9 }
 0xce3   : > { %3535 = dma.done.wait (!%p3350_p8), %s2965_s4, 128  }
 0xce4   : > { %3537 = vsyncadd (!%p3350_p8), %s2965_s4, 4294967168  ;;  %s33_s26 = sadd.s32 1, %s4414_s10   ;;  %s4417_s1 = sld [smem:[#allocation7_spill]] }
 0xce5   : > { %p30_p10 = scmp.ge.s32.totalorder %s33_s26, 6   ;;  %s4418_s22 = sld [smem:[#allocation8_spill]] }
 0xce6   : > { %s4419_s23 = sld [smem:[#allocation18_spill]]  ;;  %s4420_s24 = sld [smem:[#allocation11_spill]] }
 0xce7   : > { %s4421_s2 = sld [smem:[#allocation12_spill]]  ;;  %s4422_s25 = sld [smem:[#allocation14_spill]] }
 0xce8   : > { %s4423_s3 = sld [smem:[#allocation16_spill]]  ;;  %32 = sbr.rel (!%p30_p10) target bundleno = 18 (0x12), region = 179 }
 0xcef   :  { %2970 = vsyncpa [#allocation4], 1 }
 0xcf0   :  { %2972 = vsyncpa [#allocation4 + $0x1], 1 }

</bundles_post_ra>
